<compile_context>
chip_gen: v6e
topology: v6e:2x2x1
jax: 0.10.0
libtpu: 0.0.40
codegen_flags: <defaults>
</compile_context>

<pallas_src>
from functools import partial

import numpy as np
import jax
import jax.numpy as jnp
from jax.experimental import pallas as pl
from jax.experimental.pallas import tpu as pltpu


FE_PAD = 32    # padded edge-feature dim (19 -> 32)
OUT_PAD = 128  # padded logits dim (2 -> 128, lane-dense output)


# ----------------------------------------------------------------------------
# Host-side glue (numpy) — mirrors form_clusters / complete_graph /
# cluster_vtx_features / cluster_edge_features from mlreco.utils.gnn
# TODO(synk): these are data-dependent host ops in the original (numpy / CPU);
# they are kept as numpy glue, not Pallas.
# ----------------------------------------------------------------------------
def form_clusters(label, min_size=-1):
    clusts = []
    for b in np.unique(label[:, 3]):
        binds = np.where(label[:, 3] == b)[0]
        for c in np.unique(label[binds, 5]):
            cinds = binds[label[binds, 5] == c]
            if min_size < 0 or len(cinds) >= min_size:
                clusts.append(cinds)
    return clusts


def get_cluster_batch(label, clusts):
    return np.array([label[c[0], 3] for c in clusts])


def get_cluster_label(label, clusts):
    return np.array([label[c[0], 5] for c in clusts])


def complete_graph(batch_ids):
    edges = [[i, j]
             for i in range(len(batch_ids))
             for j in range(len(batch_ids))
             if i != j and batch_ids[i] == batch_ids[j]]
    if not edges:
        return np.empty((2, 0), dtype=np.int64)
    return np.array(edges, dtype=np.int64).T


def cluster_vtx_features(label, clusts):
    # 16-d node features: centroid(3) + covariance(9) + principal axis(3) + size(1)
    feats = []
    for c in clusts:
        pts = label[c, :3]
        center = pts.mean(axis=0)
        x = pts - center
        cov = (x.T @ x) / max(len(c), 1)
        w, v = np.linalg.eigh(cov)
        v0 = v[:, np.argmax(w)]
        if v0[np.argmax(np.abs(v0))] < 0:
            v0 = -v0
        feats.append(np.concatenate([center, cov.flatten(), v0, [len(c)]]))
    return np.array(feats, dtype=np.float32)


def cluster_edge_features(label, clusts, edge_index):
    # 19-d edge features: closest point src(3) + dst(3) + disp(3) + length(1) + outer(9)
    feats = []
    for k in range(edge_index.shape[1]):
        i, j = edge_index[0, k], edge_index[1, k]
        pi, pj = label[clusts[i], :3], label[clusts[j], :3]
        d = np.linalg.norm(pi[:, None, :] - pj[None, :, :], axis=-1)
        a, b = np.unravel_index(np.argmin(d), d.shape)
        x1, x2 = pi[a], pj[b]
        disp = x1 - x2
        lend = np.linalg.norm(disp)
        B = np.outer(disp, disp) / (lend ** 2 + 1e-8)
        feats.append(np.concatenate([x1, x2, disp, [lend], B.flatten()]))
    return np.array(feats, dtype=np.float32)


# ----------------------------------------------------------------------------
# Pallas kernel: MetaLayer-style GNN node predictor, edge-tiled
# ----------------------------------------------------------------------------
def gnn_node_kernel(x_ref, e_ref, ssrc_ref, sdst_ref, adstT_ref, invdeg_ref,
                    w1s_ref, w1d_ref, w1e_ref, b1_ref,
                    w2_ref, b2_ref,
                    w3x_ref, w3a_ref, b3_ref,
                    w4_ref, b4_ref,
                    out_ref,
                    p_scr, d_scr, agg_scr):
    i = pl.program_id(0)

    @pl.when(i == 0)
    def _init():
        x = x_ref[...]
        # fuse edge-MLP layer-1 node weights into the gather (computed once)
        p_scr[...] = jnp.dot(x, w1s_ref[...],
                             preferred_element_type=jnp.float32).astype(p_scr.dtype)
        d_scr[...] = jnp.dot(x, w1d_ref[...],
                             preferred_element_type=jnp.float32).astype(d_scr.dtype)
        agg_scr[...] = jnp.zeros_like(agg_scr)

    # edge MLP layer 1: (ssrc @ p) + (sdst @ d) + e @ w1e + b1   (f32 accum)
    h = (jnp.dot(ssrc_ref[...], p_scr[...], preferred_element_type=jnp.float32)
         + jnp.dot(sdst_ref[...], d_scr[...], preferred_element_type=jnp.float32)
         + jnp.dot(e_ref[...], w1e_ref[...], preferred_element_type=jnp.float32)
         + b1_ref[...])
    h = jnp.maximum(h, 0.0).astype(jnp.bfloat16)
    # edge MLP layer 2
    h = jnp.dot(h, w2_ref[...], preferred_element_type=jnp.float32) + b2_ref[...]
    h = jnp.maximum(h, 0.0).astype(jnp.bfloat16)
    # scatter-sum of edge messages onto destination nodes (f32 accumulator)
    agg_scr[...] += jnp.dot(adstT_ref[...], h, preferred_element_type=jnp.float32)

    @pl.when(i == pl.num_programs(0) - 1)
    def _finalize():
        x = x_ref[...]
        agg = (agg_scr[...] * invdeg_ref[...]).astype(jnp.bfloat16)   # mean
        n = (jnp.dot(x, w3x_ref[...], preferred_element_type=jnp.float32)
             + jnp.dot(agg, w3a_ref[...], preferred_element_type=jnp.float32)
             + b3_ref[...])
        n = jnp.maximum(n, 0.0).astype(jnp.bfloat16)
        out_ref[...] = (jnp.dot(n, w4_ref[...],
                                preferred_element_type=jnp.float32)
                        + b4_ref[...])


@partial(jax.jit, static_argnames=("tile_e",))
def _gnn_pallas_device(xp, ep, ssrc, sdst, adstT, inv_deg, wts, tile_e):
    C_pad, fx = xp.shape
    E_pad, fe = ep.shape
    H = wts[4].shape[0]        # w2 is (H, H)
    out_pad = wts[9].shape[1]  # padded w4 is (H, OUT_PAD)
    grid = (E_pad // tile_e,)

    in_specs = [
        pl.BlockSpec((C_pad, fx), lambda i: (0, 0)),      # x       (resident)
        pl.BlockSpec((tile_e, fe), lambda i: (i, 0)),     # e       (streamed)
        pl.BlockSpec((tile_e, C_pad), lambda i: (i, 0)),  # ssrc    (streamed)
        pl.BlockSpec((tile_e, C_pad), lambda i: (i, 0)),  # sdst    (streamed)
        pl.BlockSpec((C_pad, tile_e), lambda i: (0, i)),  # adst^T  (streamed)
        pl.BlockSpec((C_pad, 1), lambda i: (0, 0)),       # 1/deg   (resident)
    ] + [pl.BlockSpec(w.shape, lambda i: (0, 0)) for w in wts]  # weights resident

    return pl.pallas_call(
        gnn_node_kernel,
        out_shape=jax.ShapeDtypeStruct((C_pad, out_pad), jnp.float32),
        grid_spec=pltpu.PrefetchScalarGridSpec(
            num_scalar_prefetch=0,
            grid=grid,
            in_specs=in_specs,
            out_specs=pl.BlockSpec((C_pad, out_pad), lambda i: (0, 0)),
            scratch_shapes=[
                pltpu.VMEM((C_pad, H), jnp.bfloat16),   # p = x @ w1s
                pltpu.VMEM((C_pad, H), jnp.bfloat16),   # d = x @ w1d
                pltpu.VMEM((C_pad, H), jnp.float32),    # scatter-sum accumulator
            ]),
        compiler_params=pltpu.CompilerParams(
            dimension_semantics=("arbitrary",),
            vmem_limit_bytes=32 * 1024 * 1024),
    )(xp, ep, ssrc, sdst, adstT, inv_deg, *wts)


def prepare_kernel_params(params):
    """Pad + cast the node_predictor weights once for kernel use."""
    bf, f32 = jnp.bfloat16, jnp.float32
    H = params["w2"].shape[0]
    w1e = np.zeros((FE_PAD, H), np.float32)
    w1e[:params["w1e"].shape[0]] = np.asarray(params["w1e"])
    w4 = np.zeros((H, OUT_PAD), np.float32)
    w4[:, :params["w4"].shape[1]] = np.asarray(params["w4"])
    b4 = np.zeros((1, OUT_PAD), np.float32)
    b4[:, :params["b4"].shape[1]] = np.asarray(params["b4"])
    return (
        jnp.asarray(params["w1s"], bf), jnp.asarray(params["w1d"], bf),
        jnp.asarray(w1e, bf), jnp.asarray(params["b1"], f32),
        jnp.asarray(params["w2"], bf), jnp.asarray(params["b2"], f32),
        jnp.asarray(params["w3x"], bf), jnp.asarray(params["w3a"], bf),
        jnp.asarray(params["b3"], f32),
        jnp.asarray(w4, bf), jnp.asarray(b4, f32),
    )


def node_predictor_pallas(x, e, edge_index, kernel_params, tile_e=256):
    C, fx = x.shape
    E = e.shape[0]

    # coarse, lane-aligned padding buckets (128 nodes / tile_e edges) so the
    # one-hot matmuls use unmasked lanes and recompiles are rare
    C_pad = int(max(128, ((C + 127) // 128) * 128))
    E_pad = int(max(tile_e, ((E + tile_e - 1) // tile_e) * tile_e))

    xp = np.zeros((C_pad, fx), np.float32)
    xp[:C] = np.asarray(x)
    ep = np.zeros((E_pad, FE_PAD), np.float32)
    ep[:E, :e.shape[1]] = np.asarray(e)

    src = np.asarray(edge_index[0], np.int64)
    dst = np.asarray(edge_index[1], np.int64)
    rng = np.arange(E)
    ssrc = np.zeros((E_pad, C_pad), np.float32)
    sdst = np.zeros((E_pad, C_pad), np.float32)
    adstT = np.zeros((C_pad, E_pad), np.float32)   # 0/1 scatter matrix (dst, edge)
    ssrc[rng, src] = 1.0
    sdst[rng, dst] = 1.0
    adstT[dst, rng] = 1.0
    deg = np.bincount(dst, minlength=C_pad).astype(np.float32)
    inv_deg = (1.0 / np.maximum(deg, 1.0)).reshape(C_pad, 1)

    bf = jnp.bfloat16
    dev_inputs = (
        jnp.asarray(xp, bf), jnp.asarray(ep, bf),
        jnp.asarray(ssrc, bf), jnp.asarray(sdst, bf), jnp.asarray(adstT, bf),
        jnp.asarray(inv_deg, jnp.float32),
    )
    out = _gnn_pallas_device(*dev_inputs, kernel_params, tile_e=tile_e)
    return out[:C, :2]


def node_predictor_ref(x, e, edge_index, params):
    """Pure-JAX reference mirroring the kernel's bf16-operand / f32-accum math."""
    bf, f32 = jnp.bfloat16, jnp.float32
    src = jnp.asarray(edge_index[0])
    dst = jnp.asarray(edge_index[1])
    xb = jnp.asarray(x).astype(bf)
    eb = jnp.asarray(e).astype(bf)
    w1s, w1d, w1e = (params[k].astype(bf) for k in ("w1s", "w1d", "w1e"))
    w2, w3x, w3a, w4 = (params[k].astype(bf) for k in ("w2", "w3x", "w3a", "w4"))

    p = jnp.dot(xb, w1s, preferred_element_type=f32).astype(bf)
    d = jnp.dot(xb, w1d, preferred_element_type=f32).astype(bf)
    h = (p[src].astype(f32) + d[dst].astype(f32)
         + jnp.dot(eb, w1e, preferred_element_type=f32) + params["b1"])
    h = jnp.maximum(h, 0.0).astype(bf)
    h = jnp.dot(h, w2, preferred_element_type=f32) + params["b2"]
    h = jnp.maximum(h, 0.0).astype(bf)

    C = x.shape[0]
    agg = jnp.zeros((C, h.shape[1]), f32).at[dst].add(h.astype(f32))
    cnt = jnp.zeros((C,), f32).at[dst].add(1.0)
    agg = (agg * (1.0 / jnp.maximum(cnt, 1.0))[:, None]).astype(bf)

    n = (jnp.dot(xb, w3x, preferred_element_type=f32)
         + jnp.dot(agg, w3a, preferred_element_type=f32) + params["b3"])
    n = jnp.maximum(n, 0.0).astype(bf)
    return jnp.dot(n, w4, preferred_element_type=f32) + params["b4"]


def init_params(key, fx=16, fe=19, hidden=64):
    ks = jax.random.split(key, 8)
    s = 0.1
    return {
        "w1s": s * jax.random.normal(ks[0], (fx, hidden), jnp.float32),
        "w1d": s * jax.random.normal(ks[1], (fx, hidden), jnp.float32),
        "w1e": s * jax.random.normal(ks[2], (fe, hidden), jnp.float32),
        "b1": jnp.zeros((1, hidden), jnp.float32),
        "w2": s * jax.random.normal(ks[3], (hidden, hidden), jnp.float32),
        "b2": jnp.zeros((1, hidden), jnp.float32),
        "w3x": s * jax.random.normal(ks[4], (fx, hidden), jnp.float32),
        "w3a": s * jax.random.normal(ks[5], (hidden, hidden), jnp.float32),
        "b3": jnp.zeros((1, hidden), jnp.float32),
        "w4": s * jax.random.normal(ks[6], (hidden, 2), jnp.float32),
        "b4": jnp.zeros((1, 2), jnp.float32),
    }


def node_model_forward(cluster_label, params, node_type=0, node_min_size=-1):
    # TODO(synk): cluster formation / graph construction are data-dependent
    # host ops in the original (numpy); kept as numpy glue, not Pallas.
    if node_type > -1:
        mask = np.where(cluster_label[:, -1] == 0)[0]
        clusts = form_clusters(cluster_label[mask], node_min_size)
        clusts = [mask[c] for c in clusts]
    else:
        clusts = form_clusters(cluster_label, node_min_size)
    if not len(clusts):
        return None

    batch_ids = get_cluster_batch(cluster_label, clusts)
    clust_ids = get_cluster_label(cluster_label, clusts)
    edge_index = complete_graph(batch_ids)
    if not edge_index.shape[1]:
        return None

    x = cluster_vtx_features(cluster_label, clusts)               # (C, 16)
    e = cluster_edge_features(cluster_label, clusts, edge_index)  # (E, 19)

    kparams = prepare_kernel_params(params)
    node_pred = node_predictor_pallas(x, e, edge_index, kparams)  # (C, 2)
    ref = node_predictor_ref(x, e, edge_index, params)
    return {"node_pred": [node_pred], "clust_ids": [clust_ids],
            "batch_ids": [batch_ids], "edge_index": [edge_index],
            "_ref": ref}


# ----------------------------------------------------------------------------
# Synthetic input: (N, 8) = [x, y, z, batchid, value, id, groupid, shape]
# ----------------------------------------------------------------------------
def make_synthetic_data(key, n_batches=2, n_clusters=12, voxels_per_cluster=24):
    rows = []
    k = key
    for b in range(n_batches):
        for c in range(n_clusters):
            k, kc, kv = jax.random.split(k, 3)
            center = np.array(jax.random.uniform(kc, (3,)) * 20.0)
            pts = center + np.array(
                jax.random.normal(kv, (voxels_per_cluster, 3))) * 1.5
            vals = np.abs(np.array(
                jax.random.normal(k, (voxels_per_cluster, 1)))) + 0.1
            col = np.concatenate([
                pts.astype(np.float32),
                np.full((voxels_per_cluster, 1), b, np.float32),
                vals.astype(np.float32),
                np.full((voxels_per_cluster, 1), c, np.float32),  # cluster id
                np.full((voxels_per_cluster, 1), c, np.float32),  # group id
                np.zeros((voxels_per_cluster, 1), np.float32),    # shape == 0
            ], axis=1)
            rows.append(col)
    return np.concatenate(rows, axis=0)


if __name__ == "__main__":
    key = jax.random.PRNGKey(0)
    k_data, k_params = jax.random.split(key)

    # 2 batches x 12 clusters x 24 voxels -> C=24 nodes, E=264 edges
    # (E > 256 so the edge-tiled grid runs >1 step and exercises accumulation)
    cluster_label = make_synthetic_data(k_data)       # (576, 8)
    params = init_params(k_params)

    out = node_model_forward(cluster_label, params)
    assert out is not None, "no valid clusters formed"

    node_pred = out["node_pred"][0]
    jax.block_until_ready(node_pred)

    np.testing.assert_allclose(np.asarray(node_pred, dtype=np.float32),
                               np.asarray(out["_ref"], dtype=np.float32),
                               rtol=1e-2, atol=1e-2)
    assert node_pred.shape == (len(out["clust_ids"][0]), 2)
    print("KERNEL_OK")
</pallas_src>

<mosaic_0001>
module attributes {stable_mosaic.version = 11 : i64} {
  func.func @gnn_node_kernel(%arg0: i32, %arg1: memref<128x16xbf16, #tpu.memory_space<vmem>>, %arg2: memref<256x32xbf16, #tpu.memory_space<vmem>>, %arg3: memref<256x128xbf16, #tpu.memory_space<vmem>>, %arg4: memref<256x128xbf16, #tpu.memory_space<vmem>>, %arg5: memref<128x256xbf16, #tpu.memory_space<vmem>>, %arg6: memref<128x1xf32, #tpu.memory_space<vmem>>, %arg7: memref<16x64xbf16, #tpu.memory_space<vmem>>, %arg8: memref<16x64xbf16, #tpu.memory_space<vmem>>, %arg9: memref<32x64xbf16, #tpu.memory_space<vmem>>, %arg10: memref<1x64xf32, #tpu.memory_space<vmem>>, %arg11: memref<64x64xbf16, #tpu.memory_space<vmem>>, %arg12: memref<1x64xf32, #tpu.memory_space<vmem>>, %arg13: memref<16x64xbf16, #tpu.memory_space<vmem>>, %arg14: memref<64x64xbf16, #tpu.memory_space<vmem>>, %arg15: memref<1x64xf32, #tpu.memory_space<vmem>>, %arg16: memref<64x128xbf16, #tpu.memory_space<vmem>>, %arg17: memref<1x128xf32, #tpu.memory_space<vmem>>, %arg18: memref<128x128xf32, #tpu.memory_space<vmem>>, %arg19: memref<128x64xbf16, #tpu.memory_space<vmem>>, %arg20: memref<128x64xbf16, #tpu.memory_space<vmem>>, %arg21: memref<128x64xf32, #tpu.memory_space<vmem>>) attributes {dimension_semantics = [#tpu.dimension_semantics<arbitrary>], iteration_bounds = array<i64: 2>, scalar_prefetch = 0 : i64, scratch_operands = 3 : i64, tpu.core_type = #tpu.core_type<tc>, window_params = [{pipeline_mode = #tpu.pipeline_mode<synchronous>, transform_indices = @transform_0, window_bounds = array<i64: 128, 16>}, {transform_indices = @transform_1, window_bounds = array<i64: 256, 32>}, {transform_indices = @transform_2, window_bounds = array<i64: 256, 128>}, {transform_indices = @transform_3, window_bounds = array<i64: 256, 128>}, {transform_indices = @transform_4, window_bounds = array<i64: 128, 256>}, {pipeline_mode = #tpu.pipeline_mode<synchronous>, transform_indices = @transform_5, window_bounds = array<i64: 128, 1>}, {pipeline_mode = #tpu.pipeline_mode<synchronous>, transform_indices = @transform_6, window_bounds = array<i64: 16, 64>}, {pipeline_mode = #tpu.pipeline_mode<synchronous>, transform_indices = @transform_7, window_bounds = array<i64: 16, 64>}, {pipeline_mode = #tpu.pipeline_mode<synchronous>, transform_indices = @transform_8, window_bounds = array<i64: 32, 64>}, {pipeline_mode = #tpu.pipeline_mode<synchronous>, transform_indices = @transform_9, window_bounds = array<i64: 1, 64>}, {pipeline_mode = #tpu.pipeline_mode<synchronous>, transform_indices = @transform_10, window_bounds = array<i64: 64, 64>}, {pipeline_mode = #tpu.pipeline_mode<synchronous>, transform_indices = @transform_11, window_bounds = array<i64: 1, 64>}, {pipeline_mode = #tpu.pipeline_mode<synchronous>, transform_indices = @transform_12, window_bounds = array<i64: 16, 64>}, {pipeline_mode = #tpu.pipeline_mode<synchronous>, transform_indices = @transform_13, window_bounds = array<i64: 64, 64>}, {pipeline_mode = #tpu.pipeline_mode<synchronous>, transform_indices = @transform_14, window_bounds = array<i64: 1, 64>}, {pipeline_mode = #tpu.pipeline_mode<synchronous>, transform_indices = @transform_15, window_bounds = array<i64: 64, 128>}, {pipeline_mode = #tpu.pipeline_mode<synchronous>, transform_indices = @transform_16, window_bounds = array<i64: 1, 128>}, {pipeline_mode = #tpu.pipeline_mode<synchronous>, transform_indices = @transform_17, window_bounds = array<i64: 128, 128>}]} {
    %c0_i32 = arith.constant 0 : i32
    %0 = arith.cmpi eq, %arg0, %c0_i32 : i32
    %1 = arith.extui %0 : i1 to i32
    %c0_i32_0 = arith.constant 0 : i32
    %2 = arith.cmpi ne, %1, %c0_i32_0 : i32
    scf.if %2 {
      %c0_31 = arith.constant 0 : index
      %c0_32 = arith.constant 0 : index
      %36 = vector.load %arg1[%c0_31, %c0_32] : memref<128x16xbf16, #tpu.memory_space<vmem>>, vector<128x16xbf16>
      %c0_33 = arith.constant 0 : index
      %c0_34 = arith.constant 0 : index
      %37 = vector.load %arg7[%c0_33, %c0_34] : memref<16x64xbf16, #tpu.memory_space<vmem>>, vector<16x64xbf16>
      %cst_35 = arith.constant dense<0.000000e+00> : vector<128x64xf32>
      %38 = tpu.matmul %36, %37, %cst_35 {dimension_numbers = #tpu.dot_dimension_numbers<[1], [0], [0], [1], [0, 0, 1, 1], [], []>} : vector<128x16xbf16>, vector<16x64xbf16>, vector<128x64xf32> -> vector<128x64xf32>
      %39 = arith.truncf %38 : vector<128x64xf32> to vector<128x64xbf16>
      %c0_36 = arith.constant 0 : index
      %c0_37 = arith.constant 0 : index
      %40 = vector.load %arg19[%c0_36, %c0_37] : memref<128x64xbf16, #tpu.memory_space<vmem>>, vector<128x64xbf16>
      tpu.vector_store %arg19[%c0_36, %c0_37], %39 {strides = array<i32>} : memref<128x64xbf16, #tpu.memory_space<vmem>>, vector<128x64xbf16>,
      %c0_38 = arith.constant 0 : index
      %c0_39 = arith.constant 0 : index
      %41 = vector.load %arg8[%c0_38, %c0_39] : memref<16x64xbf16, #tpu.memory_space<vmem>>, vector<16x64xbf16>
      %cst_40 = arith.constant dense<0.000000e+00> : vector<128x64xf32>
      %42 = tpu.matmul %36, %41, %cst_40 {dimension_numbers = #tpu.dot_dimension_numbers<[1], [0], [0], [1], [0, 0, 1, 1], [], []>} : vector<128x16xbf16>, vector<16x64xbf16>, vector<128x64xf32> -> vector<128x64xf32>
      %43 = arith.truncf %42 : vector<128x64xf32> to vector<128x64xbf16>
      %c0_41 = arith.constant 0 : index
      %c0_42 = arith.constant 0 : index
      %44 = vector.load %arg20[%c0_41, %c0_42] : memref<128x64xbf16, #tpu.memory_space<vmem>>, vector<128x64xbf16>
      tpu.vector_store %arg20[%c0_41, %c0_42], %43 {strides = array<i32>} : memref<128x64xbf16, #tpu.memory_space<vmem>>, vector<128x64xbf16>,
      %cst_43 = arith.constant 0.000000e+00 : f32
      %45 = vector.broadcast %cst_43 : f32 to vector<128x64xf32>
      %c0_44 = arith.constant 0 : index
      %c0_45 = arith.constant 0 : index
      %46 = vector.load %arg21[%c0_44, %c0_45] : memref<128x64xf32, #tpu.memory_space<vmem>>, vector<128x64xf32>
      tpu.vector_store %arg21[%c0_44, %c0_45], %45 {strides = array<i32>} : memref<128x64xf32, #tpu.memory_space<vmem>>, vector<128x64xf32>,
    } else {
    }
    %c0 = arith.constant 0 : index
    %c0_1 = arith.constant 0 : index
    %3 = vector.load %arg3[%c0, %c0_1] : memref<256x128xbf16, #tpu.memory_space<vmem>>, vector<256x128xbf16>
    %c0_2 = arith.constant 0 : index
    %c0_3 = arith.constant 0 : index
    %4 = vector.load %arg19[%c0_2, %c0_3] : memref<128x64xbf16, #tpu.memory_space<vmem>>, vector<128x64xbf16>
    %cst = arith.constant dense<0.000000e+00> : vector<256x64xf32>
    %5 = tpu.matmul %3, %4, %cst {dimension_numbers = #tpu.dot_dimension_numbers<[1], [0], [0], [1], [0, 0, 1, 1], [], []>} : vector<256x128xbf16>, vector<128x64xbf16>, vector<256x64xf32> -> vector<256x64xf32>
    %c0_4 = arith.constant 0 : index
    %c0_5 = arith.constant 0 : index
    %6 = vector.load %arg4[%c0_4, %c0_5] : memref<256x128xbf16, #tpu.memory_space<vmem>>, vector<256x128xbf16>
    %c0_6 = arith.constant 0 : index
    %c0_7 = arith.constant 0 : index
    %7 = vector.load %arg20[%c0_6, %c0_7] : memref<128x64xbf16, #tpu.memory_space<vmem>>, vector<128x64xbf16>
    %cst_8 = arith.constant dense<0.000000e+00> : vector<256x64xf32>
    %8 = tpu.matmul %6, %7, %cst_8 {dimension_numbers = #tpu.dot_dimension_numbers<[1], [0], [0], [1], [0, 0, 1, 1], [], []>} : vector<256x128xbf16>, vector<128x64xbf16>, vector<256x64xf32> -> vector<256x64xf32>
    %9 = arith.addf %5, %8 : vector<256x64xf32>
    %c0_9 = arith.constant 0 : index
    %c0_10 = arith.constant 0 : index
    %10 = vector.load %arg2[%c0_9, %c0_10] : memref<256x32xbf16, #tpu.memory_space<vmem>>, vector<256x32xbf16>
    %c0_11 = arith.constant 0 : index
    %c0_12 = arith.constant 0 : index
    %11 = vector.load %arg9[%c0_11, %c0_12] : memref<32x64xbf16, #tpu.memory_space<vmem>>, vector<32x64xbf16>
    %cst_13 = arith.constant dense<0.000000e+00> : vector<256x64xf32>
    %12 = tpu.matmul %10, %11, %cst_13 {dimension_numbers = #tpu.dot_dimension_numbers<[1], [0], [0], [1], [0, 0, 1, 1], [], []>} : vector<256x32xbf16>, vector<32x64xbf16>, vector<256x64xf32> -> vector<256x64xf32>
    %13 = arith.addf %9, %12 : vector<256x64xf32>
    %c0_14 = arith.constant 0 : index
    %c0_15 = arith.constant 0 : index
    %14 = vector.load %arg10[%c0_14, %c0_15] : memref<1x64xf32, #tpu.memory_space<vmem>>, vector<1x64xf32>
    %15 = vector.broadcast %14 : vector<1x64xf32> to vector<256x64xf32>
    %16 = arith.addf %13, %15 : vector<256x64xf32>
    %cst_16 = arith.constant 0.000000e+00 : f32
    %17 = vector.broadcast %cst_16 : f32 to vector<256x64xf32>
    %18 = arith.maximumf %16, %17 : vector<256x64xf32>
    %19 = arith.truncf %18 : vector<256x64xf32> to vector<256x64xbf16>
    %c0_17 = arith.constant 0 : index
    %c0_18 = arith.constant 0 : index
    %20 = vector.load %arg11[%c0_17, %c0_18] : memref<64x64xbf16, #tpu.memory_space<vmem>>, vector<64x64xbf16>
    %cst_19 = arith.constant dense<0.000000e+00> : vector<256x64xf32>
    %21 = tpu.matmul %19, %20, %cst_19 {dimension_numbers = #tpu.dot_dimension_numbers<[1], [0], [0], [1], [0, 0, 1, 1], [], []>} : vector<256x64xbf16>, vector<64x64xbf16>, vector<256x64xf32> -> vector<256x64xf32>
    %c0_20 = arith.constant 0 : index
    %c0_21 = arith.constant 0 : index
    %22 = vector.load %arg12[%c0_20, %c0_21] : memref<1x64xf32, #tpu.memory_space<vmem>>, vector<1x64xf32>
    %23 = vector.broadcast %22 : vector<1x64xf32> to vector<256x64xf32>
    %24 = arith.addf %21, %23 : vector<256x64xf32>
    %cst_22 = arith.constant 0.000000e+00 : f32
    %25 = vector.broadcast %cst_22 : f32 to vector<256x64xf32>
    %26 = arith.maximumf %24, %25 : vector<256x64xf32>
    %27 = arith.truncf %26 : vector<256x64xf32> to vector<256x64xbf16>
    %c0_23 = arith.constant 0 : index
    %c0_24 = arith.constant 0 : index
    %28 = vector.load %arg21[%c0_23, %c0_24] : memref<128x64xf32, #tpu.memory_space<vmem>>, vector<128x64xf32>
    %c0_25 = arith.constant 0 : index
    %c0_26 = arith.constant 0 : index
    %29 = vector.load %arg5[%c0_25, %c0_26] : memref<128x256xbf16, #tpu.memory_space<vmem>>, vector<128x256xbf16>
    %cst_27 = arith.constant dense<0.000000e+00> : vector<128x64xf32>
    %30 = tpu.matmul %29, %27, %cst_27 {dimension_numbers = #tpu.dot_dimension_numbers<[1], [0], [0], [1], [0, 0, 1, 1], [], []>} : vector<128x256xbf16>, vector<256x64xbf16>, vector<128x64xf32> -> vector<128x64xf32>
    %31 = arith.addf %28, %30 : vector<128x64xf32>
    %c0_28 = arith.constant 0 : index
    %c0_29 = arith.constant 0 : index
    %32 = vector.load %arg21[%c0_28, %c0_29] : memref<128x64xf32, #tpu.memory_space<vmem>>, vector<128x64xf32>
    tpu.vector_store %arg21[%c0_28, %c0_29], %31 {strides = array<i32>} : memref<128x64xf32, #tpu.memory_space<vmem>>, vector<128x64xf32>,
    %c1_i32 = arith.constant 1 : i32
    %33 = arith.cmpi eq, %arg0, %c1_i32 : i32
    %34 = arith.extui %33 : i1 to i32
    %c0_i32_30 = arith.constant 0 : i32
    %35 = arith.cmpi ne, %34, %c0_i32_30 : i32
    scf.if %35 {
      %c0_31 = arith.constant 0 : index
      %c0_32 = arith.constant 0 : index
      %36 = vector.load %arg1[%c0_31, %c0_32] : memref<128x16xbf16, #tpu.memory_space<vmem>>, vector<128x16xbf16>
      %c0_33 = arith.constant 0 : index
      %c0_34 = arith.constant 0 : index
      %37 = vector.load %arg21[%c0_33, %c0_34] : memref<128x64xf32, #tpu.memory_space<vmem>>, vector<128x64xf32>
      %c0_35 = arith.constant 0 : index
      %c0_36 = arith.constant 0 : index
      %38 = vector.load %arg6[%c0_35, %c0_36] : memref<128x1xf32, #tpu.memory_space<vmem>>, vector<128x1xf32>
      %39 = vector.broadcast %38 : vector<128x1xf32> to vector<128x64xf32>
      %40 = arith.mulf %37, %39 : vector<128x64xf32>
      %41 = arith.truncf %40 : vector<128x64xf32> to vector<128x64xbf16>
      %c0_37 = arith.constant 0 : index
      %c0_38 = arith.constant 0 : index
      %42 = vector.load %arg13[%c0_37, %c0_38] : memref<16x64xbf16, #tpu.memory_space<vmem>>, vector<16x64xbf16>
      %cst_39 = arith.constant dense<0.000000e+00> : vector<128x64xf32>
      %43 = tpu.matmul %36, %42, %cst_39 {dimension_numbers = #tpu.dot_dimension_numbers<[1], [0], [0], [1], [0, 0, 1, 1], [], []>} : vector<128x16xbf16>, vector<16x64xbf16>, vector<128x64xf32> -> vector<128x64xf32>
      %c0_40 = arith.constant 0 : index
      %c0_41 = arith.constant 0 : index
      %44 = vector.load %arg14[%c0_40, %c0_41] : memref<64x64xbf16, #tpu.memory_space<vmem>>, vector<64x64xbf16>
      %cst_42 = arith.constant dense<0.000000e+00> : vector<128x64xf32>
      %45 = tpu.matmul %41, %44, %cst_42 {dimension_numbers = #tpu.dot_dimension_numbers<[1], [0], [0], [1], [0, 0, 1, 1], [], []>} : vector<128x64xbf16>, vector<64x64xbf16>, vector<128x64xf32> -> vector<128x64xf32>
      %46 = arith.addf %43, %45 : vector<128x64xf32>
      %c0_43 = arith.constant 0 : index
      %c0_44 = arith.constant 0 : index
      %47 = vector.load %arg15[%c0_43, %c0_44] : memref<1x64xf32, #tpu.memory_space<vmem>>, vector<1x64xf32>
      %48 = vector.broadcast %47 : vector<1x64xf32> to vector<128x64xf32>
      %49 = arith.addf %46, %48 : vector<128x64xf32>
      %cst_45 = arith.constant 0.000000e+00 : f32
      %50 = vector.broadcast %cst_45 : f32 to vector<128x64xf32>
      %51 = arith.maximumf %49, %50 : vector<128x64xf32>
      %52 = arith.truncf %51 : vector<128x64xf32> to vector<128x64xbf16>
      %c0_46 = arith.constant 0 : index
      %c0_47 = arith.constant 0 : index
      %53 = vector.load %arg16[%c0_46, %c0_47] : memref<64x128xbf16, #tpu.memory_space<vmem>>, vector<64x128xbf16>
      %cst_48 = arith.constant dense<0.000000e+00> : vector<128x128xf32>
      %54 = tpu.matmul %52, %53, %cst_48 {dimension_numbers = #tpu.dot_dimension_numbers<[1], [0], [0], [1], [0, 0, 1, 1], [], []>} : vector<128x64xbf16>, vector<64x128xbf16>, vector<128x128xf32> -> vector<128x128xf32>
      %c0_49 = arith.constant 0 : index
      %c0_50 = arith.constant 0 : index
      %55 = vector.load %arg17[%c0_49, %c0_50] : memref<1x128xf32, #tpu.memory_space<vmem>>, vector<1x128xf32>
      %56 = vector.broadcast %55 : vector<1x128xf32> to vector<128x128xf32>
      %57 = arith.addf %54, %56 : vector<128x128xf32>
      %c0_51 = arith.constant 0 : index
      %c0_52 = arith.constant 0 : index
      %58 = vector.load %arg18[%c0_51, %c0_52] : memref<128x128xf32, #tpu.memory_space<vmem>>, vector<128x128xf32>
      tpu.vector_store %arg18[%c0_51, %c0_52], %57 {strides = array<i32>} : memref<128x128xf32, #tpu.memory_space<vmem>>, vector<128x128xf32>,
    } else {
    }
    return
  }
  func.func @transform_0(%arg0: i32) -> (i32, i32) {
    %c0_i32 = arith.constant 0 : i32
    %c0_i32_0 = arith.constant 0 : i32
    %c0_i32_1 = arith.constant 0 : i32
    return %c0_i32, %c0_i32_0 : i32, i32
  }
  func.func @transform_1(%arg0: i32) -> (i32, i32) {
    %c0_i32 = arith.constant 0 : i32
    %c0_i32_0 = arith.constant 0 : i32
    return %arg0, %c0_i32 : i32, i32
  }
  func.func @transform_2(%arg0: i32) -> (i32, i32) {
    %c0_i32 = arith.constant 0 : i32
    %c0_i32_0 = arith.constant 0 : i32
    return %arg0, %c0_i32 : i32, i32
  }
  func.func @transform_3(%arg0: i32) -> (i32, i32) {
    %c0_i32 = arith.constant 0 : i32
    %c0_i32_0 = arith.constant 0 : i32
    return %arg0, %c0_i32 : i32, i32
  }
  func.func @transform_4(%arg0: i32) -> (i32, i32) {
    %c0_i32 = arith.constant 0 : i32
    %c0_i32_0 = arith.constant 0 : i32
    return %c0_i32, %arg0 : i32, i32
  }
  func.func @transform_5(%arg0: i32) -> (i32, i32) {
    %c0_i32 = arith.constant 0 : i32
    %c0_i32_0 = arith.constant 0 : i32
    %c0_i32_1 = arith.constant 0 : i32
    return %c0_i32, %c0_i32_0 : i32, i32
  }
  func.func @transform_6(%arg0: i32) -> (i32, i32) {
    %c0_i32 = arith.constant 0 : i32
    %c0_i32_0 = arith.constant 0 : i32
    %c0_i32_1 = arith.constant 0 : i32
    return %c0_i32, %c0_i32_0 : i32, i32
  }
  func.func @transform_7(%arg0: i32) -> (i32, i32) {
    %c0_i32 = arith.constant 0 : i32
    %c0_i32_0 = arith.constant 0 : i32
    %c0_i32_1 = arith.constant 0 : i32
    return %c0_i32, %c0_i32_0 : i32, i32
  }
  func.func @transform_8(%arg0: i32) -> (i32, i32) {
    %c0_i32 = arith.constant 0 : i32
    %c0_i32_0 = arith.constant 0 : i32
    %c0_i32_1 = arith.constant 0 : i32
    return %c0_i32, %c0_i32_0 : i32, i32
  }
  func.func @transform_9(%arg0: i32) -> (i32, i32) {
    %c0_i32 = arith.constant 0 : i32
    %c0_i32_0 = arith.constant 0 : i32
    %c0_i32_1 = arith.constant 0 : i32
    return %c0_i32, %c0_i32_0 : i32, i32
  }
  func.func @transform_10(%arg0: i32) -> (i32, i32) {
    %c0_i32 = arith.constant 0 : i32
    %c0_i32_0 = arith.constant 0 : i32
    %c0_i32_1 = arith.constant 0 : i32
    return %c0_i32, %c0_i32_0 : i32, i32
  }
  func.func @transform_11(%arg0: i32) -> (i32, i32) {
    %c0_i32 = arith.constant 0 : i32
    %c0_i32_0 = arith.constant 0 : i32
    %c0_i32_1 = arith.constant 0 : i32
    return %c0_i32, %c0_i32_0 : i32, i32
  }
  func.func @transform_12(%arg0: i32) -> (i32, i32) {
    %c0_i32 = arith.constant 0 : i32
    %c0_i32_0 = arith.constant 0 : i32
    %c0_i32_1 = arith.constant 0 : i32
    return %c0_i32, %c0_i32_0 : i32, i32
  }
  func.func @transform_13(%arg0: i32) -> (i32, i32) {
    %c0_i32 = arith.constant 0 : i32
    %c0_i32_0 = arith.constant 0 : i32
    %c0_i32_1 = arith.constant 0 : i32
    return %c0_i32, %c0_i32_0 : i32, i32
  }
  func.func @transform_14(%arg0: i32) -> (i32, i32) {
    %c0_i32 = arith.constant 0 : i32
    %c0_i32_0 = arith.constant 0 : i32
    %c0_i32_1 = arith.constant 0 : i32
    return %c0_i32, %c0_i32_0 : i32, i32
  }
  func.func @transform_15(%arg0: i32) -> (i32, i32) {
    %c0_i32 = arith.constant 0 : i32
    %c0_i32_0 = arith.constant 0 : i32
    %c0_i32_1 = arith.constant 0 : i32
    return %c0_i32, %c0_i32_0 : i32, i32
  }
  func.func @transform_16(%arg0: i32) -> (i32, i32) {
    %c0_i32 = arith.constant 0 : i32
    %c0_i32_0 = arith.constant 0 : i32
    %c0_i32_1 = arith.constant 0 : i32
    return %c0_i32, %c0_i32_0 : i32, i32
  }
  func.func @transform_17(%arg0: i32) -> (i32, i32) {
    %c0_i32 = arith.constant 0 : i32
    %c0_i32_0 = arith.constant 0 : i32
    %c0_i32_1 = arith.constant 0 : i32
    return %c0_i32, %c0_i32_0 : i32, i32
  }
}

</mosaic_0001>

<bundles_post_ra>
// kernel: _gnn_pallas_device.1
= control target key start
LH: loop header
LB: loop body
LE: loop exit
PB: predicated region body
PF: predicated region fallthrough
CT: control target
= control target key end

     0   :  { %s5855_s0 = inlined_call_operand.vmem [shape: bf16[128,16], index: 0, kind: input, shape index: {}]   ;;  %s5856_s1 = inlined_call_operand.vmem [shape: bf16[512,32], index: 1, kind: input, shape index: {}]   ;;  %s5857_s2 = inlined_call_operand.vmem [shape: bf16[512,128], index: 2, kind: input, shape index: {}]   ;;  %s5858_s3 = inlined_call_operand.vmem [shape: bf16[512,128], index: 3, kind: input, shape index: {}]   ;;  %s5859_s4 = inlined_call_operand.hbm [shape: bf16[128,512], index: 4, kind: input, shape index: {}]   ;;  %s5860_s5 = inlined_call_operand.vmem [shape: f32[128,1], index: 5, kind: input, shape index: {}]   ;;  %s5861_s6 = inlined_call_operand.hbm [shape: bf16[16,64], index: 6, kind: input, shape index: {}]   ;;  %s5862_s7 = inlined_call_operand.hbm [shape: bf16[16,64], index: 7, kind: input, shape index: {}]   ;;  %s5863_s8 = inlined_call_operand.hbm [shape: bf16[32,64], index: 8, kind: input, shape index: {}]   ;;  %s5864_s9 = inlined_call_operand.vmem [shape: f32[1,64], index: 9, kind: input, shape index: {}]   ;;  %s5865_s10 = inlined_call_operand.hbm [shape: bf16[64,64], index: 10, kind: input, shape index: {}]   ;;  %s5866_s11 = inlined_call_operand.vmem [shape: f32[1,64], index: 11, kind: input, shape index: {}]   ;;  %s5867_s12 = inlined_call_operand.hbm [shape: bf16[16,64], index: 12, kind: input, shape index: {}]   ;;  %s5868_s13 = inlined_call_operand.hbm [shape: bf16[64,64], index: 13, kind: input, shape index: {}]   ;;  %s5869_s14 = inlined_call_operand.vmem [shape: f32[1,64], index: 14, kind: input, shape index: {}]   ;;  %s5870_s15 = inlined_call_operand.vmem [shape: bf16[64,128], index: 15, kind: input, shape index: {}]   ;;  %s5871_s16 = inlined_call_operand.vmem [shape: f32[1,128], index: 16, kind: input, shape index: {}]   ;;  %s5872_s17 = inlined_call_operand.hbm [shape: f32[128,128], index: 17, kind: output, shape index: {}]  }
   0x1   :  { %5878 = sst [smem:[#allocation23_spill]] %s5855_s0 }
   0x2   :  { %5879 = sst [smem:[#allocation24_spill]] %s5856_s1 }
   0x3   :  { %5880 = sst [smem:[#allocation25_spill]] %s5861_s6 }
   0x4   :  { %5881 = sst [smem:[#allocation26_spill]] %s5862_s7 }
   0x5   :  { %5882 = sst [smem:[#allocation27_spill]] %s5863_s8 }
   0x6   :  { %5883 = sst [smem:[#allocation28_spill]] %s5871_s16 }
   0x7   :  { %5884 = sst [smem:[#allocation29_spill]] %s5872_s17 }
   0x8   :  { %22 = vsyncpa [#allocation6], 0 }
   0x9   :  { %24 = vsyncpa [#allocation6 + $0x1], 0 }
   0xa   :  { %25 = vsyncpa [#allocation9], 0 }
   0xb   :  { %26 = vsyncpa [#allocation12], 0 }
   0xc   :  { %27 = vsyncpa [#allocation15], 0 }
   0xd   :  { %28 = vsyncpa [#allocation7], 0  ;;  %s5123_s24 = smov 0   ;;  %s5125_s25 = smov 0  }
   0xe   :  { %s5127_s26 = smov 0   ;;  %s5129_s27 = smov 0  }
   0xf LB: > { %s5016_s28 = smov [#allocation8]   ;;  %s5144_s0 = sadd.s32 4294967295, %s5014_s27   ;;  %s5014_s27 = sphi %s5129_s27, %s5910_s27   ;;  %s5010_s26 = sphi %s5127_s26, %s5909_s26   ;;  %s5006_s25 = sphi %s5125_s25, %s5908_s25   ;;  %s5002_s24 = sphi %s5123_s24, %s5907_s24  }
  0x10   : > { %s455_s29 = sshll.u32 %s5016_s28, 4  ;;  %p3739_p0 = scmp.ge.s32.totalorder %s5014_s27, 1  ;;  %s456_s29 = int_to_ptr.vmem [resolvable:$true] %s455_s29 }
  0x11   : > { %p5875_p1 = scmp.eq.s32.totalorder %s5144_s0, 0  ;;  %p437_p2 = scmp.lt.s32.totalorder %s5014_s27, 3 }
  0x12   : > { %s5017_s18 = smov [#allocation11]   ;;  %s5018_s20 = smov [#allocation14]  }
  0x13   : > { %p5150_p4 = pnand %p3739_p0, %p437_p2  ;;  %s481_s19 = sshll.u32 %s5017_s18, 4  ;;  %s5162_s19 = int_to_ptr.vmem [resolvable:$true] %s481_s19 }
  0x14   : > { %s513_s21 = sshll.u32 %s5018_s20, 4  ;;  %s4767_s23 = scalar_lea.vmem %s456_s29, 128  ;;  %s5164_s21 = int_to_ptr.vmem [resolvable:$true] %s513_s21 }
  0x15   : > { %s5885_s30 = scalar_select %p5150_p4, 1, 0 }
  0x16   : > { %p4547_p5 = pneg %p5150_p4  ;;  %p4768_p8 = scmp.ne.s32.totalorder %s456_s29, %s4767_s23 }
  0x17   : > { %p4775_p11 = scmp.lt.s32.totalorder %s456_s29, %s456_s29  ;;  %p4776_p12 = scmp.lt.s32.totalorder %s4767_s23, %s4767_s23 }
  0x18   : > { %p5158_p6 = pnand %p4547_p5, %p5875_p1 }
  0x19   : > { %p4777_p13 = por %p4776_p12, %p4775_p11 }
  0x1a   : > { %p5168_p7 = pneg %p5158_p6 }
  0x1c   : > { %p4770_p9 = pnand %p4768_p8, %p5168_p7 }
  0x1e   : > { %p4771_p10 = pneg %p4770_p9 }
  0x20   : > { %p4778_p0 = pnand %p4777_p13, %p4771_p10 }
  0x22   : > { %4781 = shalt.err (!%p4778_p0)
}
  0x23   : > { %s5019_s28 = smov 64   ;;  %s5020_s18 = smov 4  }
  0x24   : > { %s5888_s6 = sld [smem:[#allocation25_spill]]  ;;  %s4793_s16 = scalar_lea.vmem %s5162_s19, 256 }
  0x25   : > { %p4794_p2 = scmp.ne.s32.totalorder %s5162_s19, %s4793_s16  ;;  %p4801_p9 = scmp.lt.s32.totalorder %s5162_s19, %s5162_s19 }
  0x26   : > { %p4802_p10 = scmp.lt.s32.totalorder %s4793_s16, %s4793_s16 }
  0x27   : > { %p4796_p5 = pnand %p4794_p2, %p5168_p7 }
  0x28   : > { %p4803_p11 = por %p4802_p10, %p4801_p9 }
  0x29   : > { %p4797_p8 = pneg %p4796_p5 }
  0x2a   : > { %4550 = dma.hbm_to_vmem [thread:$0]  (!%p5158_p6), %s5888_s6, 128, %s456_s29, [#allocation9], %s5019_s28, %s5019_s28, %s5020_s18  }
  0x2b   : > { %p4804_p12 = pnand %p4803_p11, %p4797_p8 }
  0x2d   : > { %4807 = shalt.err (!%p4804_p12)
}
  0x2e   : > { %s5889_s8 = sld [smem:[#allocation27_spill]]  ;;  %s4819_s29 = scalar_lea.vmem %s5164_s21, 128 }
  0x2f   : > { %p4820_p13 = scmp.ne.s32.totalorder %s5164_s21, %s4819_s29  ;;  %p4827_p5 = scmp.lt.s32.totalorder %s5164_s21, %s5164_s21 }
  0x30   : > { %p4828_p8 = scmp.lt.s32.totalorder %s4819_s29, %s4819_s29 }
  0x31   : > { %p4822_p0 = pnand %p4820_p13, %p5168_p7 }
  0x32   : > { %p4829_p9 = por %p4828_p8, %p4827_p5 }
  0x33   : > { %p4823_p2 = pneg %p4822_p0 }
  0x34   : > { %4556 = dma.hbm_to_vmem [thread:$0]  (!%p5158_p6), %s5889_s8, 256, %s5162_s19, [#allocation12], %s5019_s28, %s5019_s28, %s5020_s18  }
  0x35   : > { %p4830_p10 = pnand %p4829_p9, %p4823_p2 }
  0x37   : > { %4833 = shalt.err (!%p4830_p10)
}
  0x38   : > { %4562 = dma.hbm_to_vmem [thread:$0]  (!%p5158_p6), %s5867_s12, 128, %s5164_s21, [#allocation15], %s5019_s28, %s5019_s28, %s5020_s18  }
  0x39   : > { %s5021_s19 = smov [#allocation10]   ;;  %s5022_s17 = smov [#allocation13]  }
  0x3a   : > { %s468_s23 = sshll.u32 %s5021_s19, 4  ;;  %s497_s6 = sshll.u32 %s5022_s17, 4  ;;  %s469_s23 = int_to_ptr.vmem [resolvable:$true] %s468_s23  ;;  %s498_s6 = int_to_ptr.vmem [resolvable:$true] %s497_s6 }
  0x3b   : > { %s4845_s29 = scalar_lea.vmem %s469_s23, 128  ;;  %p4853_p0 = scmp.lt.s32.totalorder %s469_s23, %s469_s23 }
  0x3c   : > { %p4846_p11 = scmp.ne.s32.totalorder %s469_s23, %s4845_s29  ;;  %p4854_p2 = scmp.lt.s32.totalorder %s4845_s29, %s4845_s29 }
  0x3e   : > { %p4848_p12 = pnand %p4846_p11, %p5168_p7  ;;  %p4855_p5 = por %p4854_p2, %p4853_p0 }
  0x40   : > { %p4849_p13 = pneg %p4848_p12 }
  0x42   : > { %p4856_p8 = pnand %p4855_p5, %p4849_p13 }
  0x44   : > { %4859 = shalt.err (!%p4856_p8)
}
  0x45   : > { %s5890_s7 = sld [smem:[#allocation26_spill]]  ;;  %s4871_s20 = scalar_lea.vmem %s498_s6, 512 }
  0x46   : > { %p4872_p9 = scmp.ne.s32.totalorder %s498_s6, %s4871_s20  ;;  %p4879_p12 = scmp.lt.s32.totalorder %s498_s6, %s498_s6 }
  0x47   : > { %p4880_p0 = scmp.lt.s32.totalorder %s4871_s20, %s4871_s20 }
  0x48   : > { %p4874_p10 = pnand %p4872_p9, %p5168_p7 }
  0x49   : > { %p4881_p13 = por %p4880_p0, %p4879_p12 }
  0x4a   : > { %p4875_p11 = pneg %p4874_p10 }
  0x4b   : > { %4553 = dma.hbm_to_vmem [thread:$0]  (!%p5158_p6), %s5890_s7, 128, %s469_s23, [#allocation9], %s5019_s28, %s5019_s28, %s5020_s18  }
  0x4c   : > { %p4882_p2 = pnand %p4881_p13, %p4875_p11 }
  0x4e   : > { %4885 = shalt.err (!%p4882_p2)
}
  0x4f   : > { %4559 = dma.hbm_to_vmem [thread:$0]  (!%p5158_p6), %s5865_s10, 512, %s498_s6, [#allocation12], %s5019_s28, %s5019_s28, %s5020_s18  }
  0x50   : > { %s5023_s23 = smov [#allocation16]  }
  0x51   : > { %s526_s29 = sshll.u32 %s5023_s23, 4  ;;  %s527_s29 = int_to_ptr.vmem [resolvable:$true] %s526_s29 }
  0x52   : > { %s4897_s21 = scalar_lea.vmem %s527_s29, 512  ;;  %p4905_p10 = scmp.lt.s32.totalorder %s527_s29, %s527_s29 }
  0x53   : > { %p4898_p5 = scmp.ne.s32.totalorder %s527_s29, %s4897_s21  ;;  %p4906_p11 = scmp.lt.s32.totalorder %s4897_s21, %s4897_s21 }
  0x55   : > { %p4900_p8 = pnand %p4898_p5, %p5168_p7  ;;  %p4907_p12 = por %p4906_p11, %p4905_p10 }
  0x57   : > { %p4901_p9 = pneg %p4900_p8 }
  0x59   : > { %p4908_p0 = pnand %p4907_p12, %p4901_p9 }
  0x5b   : > { %4911 = shalt.err (!%p4908_p0)
}
  0x5c   : > { %4565 = dma.hbm_to_vmem [thread:$0]  (!%p5158_p6), %s5868_s13, 512, %s527_s29, [#allocation15], %s5019_s28, %s5019_s28, %s5020_s18  }
  0x5d   : > { %s5243_s1 = sadd.s32 1, %s5014_s27   ;;  %s140_s22 = sadd.s32 1, %s5010_s26 }
  0x5e   : > { %s137_s20 = ssub.s32 %s5014_s27, %s5243_s1  ;;  %p147_p7 = scmp.ne.s32.totalorder %s5010_s26, %s5006_s25 }
  0x5f   : > { %p138_p13 = scmp.eq.s32.totalorder %s137_s20, 0  ;;  %p148_p2 = scmp.eq.s32.totalorder %s5014_s27, 0 }
  0x60   : > { %p153_p5 = scmp.ne.s32.totalorder %s5006_s25, %s5002_s24  ;;  %p4576_p8 = scmp.lt.s32.totalorder %s5014_s27, 2 }
  0x61   : > { %s5255_s19 = scalar_select %p138_p13, %s5010_s26, %s140_s22  }
  0x62   : > { %p149_p9 = por %p148_p2, %p147_p7  ;;  %p5259_p10 = por %p5875_p1, %p153_p5 }
  0x63   : > { %s576_s23 = sand.u32 1, %s5010_s26   ;;  %s3991_s28 = sshll.u32 %s5014_s27, 7 }
  0x64   : > { %s5891_s17 = scalar_select %p5259_p10, 1, 0 }
  0x65   : > { %s3747_s18 = sshll.u32 %s576_s23, 7  ;;  %s5268_s16 = scalar_lea.hbm %s5859_s4, %s3991_s28 }
  0x66   : > { %s580_s24 = scalar_lea.vmem [#allocation5], %s3747_s18  ;;  %p5270_p6 = pnand %p4576_p8, %p149_p9 }
  0x67   : > { %s587_s6 = sshll.u32 %s580_s24, 4  ;;  %s5276_s20 = scalar_lea.sflag [#allocation6], %s576_s23  ;;  %s5274_s6 = int_to_ptr.vmem [resolvable:$true] %s587_s6 }
  0x68   : > { %s4912_s27 = scalar_lea.hbm %s5268_s16, 2048  ;;  %p4914_p12 = pneg %p5270_p6 }
  0x69   : > { %p4913_p11 = scmp.ne.s32.totalorder %s5268_s16, %s4912_s27  ;;  %s4917_s18 = scalar_lea.hbm %s5859_s4, 4096 }
  0x6a   : > { %p4918_p13 = scmp.lt.s32.totalorder %s5268_s16, %s5859_s4  ;;  %p4919_p2 = scmp.lt.s32.totalorder %s4917_s18, %s4912_s27 }
  0x6b   : > { %p4915_p0 = pnand %p4914_p12, %p4913_p11 }
  0x6c   : > { %p4920_p5 = por %p4919_p2, %p4918_p13 }
  0x6d   : > { %p4916_p7 = pneg %p4915_p0 }
  0x6f   : > { %p4921_p8 = pnand %p4920_p5, %p4916_p7 }
  0x71   : > { %4924 = shalt.err (!%p4921_p8)
}
  0x72   : > { %s4925_s23 = scalar_lea.vmem %s5274_s6, 2048  ;;  %s5024_s7 = smov [#allocation5]  }
  0x73   : > { %p4926_p9 = scmp.ne.s32.totalorder %s5274_s6, %s4925_s23  ;;  %s4930_s8 = sshll.u32 %s5024_s7, 4  ;;  %s4931_s8 = int_to_ptr.vmem [resolvable:$false] %s4930_s8 }
  0x74   : > { %s4932_s28 = scalar_lea.vmem %s4931_s8, 4096  ;;  %p4933_p0 = scmp.lt.s32.totalorder %s5274_s6, %s4931_s8 }
  0x75   : > { %p4928_p3 = pnand %p4926_p9, %p4914_p12  ;;  %p4934_p1 = scmp.lt.s32.totalorder %s4932_s28, %s4925_s23 }
  0x77   : > { %p4929_p11 = pneg %p4928_p3  ;;  %p4935_p10 = por %p4934_p1, %p4933_p0 }
  0x79   : > { %p4936_p4 = pnand %p4935_p10, %p4929_p11 }
  0x7b   : > { %4939 = shalt.err (!%p4936_p4)
}
  0x7c   : > { %s5025_s27 = smov 256   ;;  %s5026_s29 = smov 128  }
  0x7d   : > { %s5027_s18 = smov 8   ;;  %p5893_p3 = scmp.ne.s32.totalorder %s5885_s30, 0 }
  0x7e   : > { %4569 = dma.hbm_to_vmem [thread:$0]  (!%p5270_p6), %s5268_s16, 2048, %s5274_s6, %s5276_s20, %s5025_s27, %s5026_s29, %s5027_s18  }
  0x7f   : > { %599 = sbr.rel (%p5893_p3) target bundleno = 1834 (0x72a), region = 88  ;;  %s601_s7 = sand.u32 (!%p5893_p3), 1, %s5006_s25  }
  0x80   : > { %s3751_s8 = sshll.u32 (!%p5893_p3), %s601_s7, 7  ;;  %s602_s21 = scalar_lea.sflag (!%p5893_p3), [#allocation6], %s601_s7 }
  0x81   : > { %s5300_s24 = scalar_lea.vmem (!%p5893_p3), [#allocation5], %s3751_s8  ;;  %p5894_p1 = scmp.ne.s32.totalorder (!%p5893_p3), %s5891_s17, 0 }
  0x84   : > { %4981 = dma.done.wait (%p5894_p1), %s602_s21, 2048  }
  0x85   : > { %4983 = vsyncadd (%p5894_p1), %s602_s21, 4294965248  ;;  %p5895_p4 = scmp.eq.s32.totalorder %s5144_s0, 0 }
  0x87   : > { %4985 = dma.done.wait (%p5895_p4), [#allocation9], 256   ;;  %p5896_p10 = pmov %p5895_p4 }
  0x88   : > { %p5897_p6 = pmov %p5895_p4 }
  0x89   : > { %4987 = vsyncadd (%p5896_p10), [#allocation9], 4294967040 }
  0x8a   : > { %4989 = dma.done.wait (%p5897_p6), [#allocation12], 768   ;;  %p5898_p12 = pmov %p5895_p4 }
  0x8b   : > { %p5899_p7 = pmov %p5895_p4 }
  0x8c   : > { %4991 = vsyncadd (%p5898_p12), [#allocation12], 4294966528 }
  0x8d   : > { %4993 = dma.done.wait (%p5899_p7), [#allocation15], 640   ;;  %p5900_p13 = pmov %p5895_p4 }
  0x8e   : > { %s3758_s30 = sshll.u32 %s5144_s0, 5  ;;  %s5901_s22 = sld [smem:[#allocation24_spill]] }
  0x8f   : > { %4995 = vsyncadd (%p5900_p13), [#allocation15], 4294966656  ;;  %p691_p2 = scmp.lt.s32.totalorder %s3758_s30, 63  ;;  %p5902_p5 = scmp.ne.s32.totalorder %s5144_s0, 0 }
  0x91   : > { %s5912_s30 = smov (!%p691_p2, %s3758_s30), 63  ;;  %713 = sbr.rel (%p5902_p5) target bundleno = 381 (0x17d), region = 120 }
  0x92   : > { %s3759_s17 = sshll.u32 %s5912_s30, 2  ;;  %s5903_s30 = sld [smem:[#allocation23_spill]] (!%p5902_p5) }
  0x93   : > { %s5327_s27 = scalar_lea.vmem %s5857_s2, %s3759_s17  ;;  %s5332_s7 = scalar_lea.vmem %s5858_s3, %s3759_s17 }
  0x94   : > { %s5322_s20 = scalar_lea.vmem %s5901_s22, %s3759_s17 }
  0x96   : > { %v4633_v0 = vld [vmem:[#allocation8] sm:$0xff]   ;;  %v4634_v1 = vld [vmem:[#allocation10] sm:$0xff]   ;;  %vm778_vm0 = vcmask 130048   ;;  %vm1166_vm1 = vcmask 523264   ;;  %v5028_v10 = vmov 0.0   ;;  %vm964_vm2 = vcmask 519168  }
  0x97   : > { %4225 = vmatprep.subr.bf16.mxu0 %v4633_v0  ;;  %4243 = vmatprep.subr.bf16.mxu1 %v4634_v1  ;;  %1167 = vst.msk [vmem:[#allocation4] sm:$0xff] %vm1166_vm1, %v5028_v10  ;;  %1168 = vst.msk [vmem:[#allocation4 + $0x8] sm:$0xff] %vm1166_vm1, %v5028_v10 }
  0x98   : > { %v4635_v2 = vld [vmem:[%s5903_s30] sm:$0xff]   ;;  %4226 = vmatpush3.bf16.msra.mxu0 %v4633_v0  ;;  %v4636_v3 = vld [vmem:[%s5903_s30 + $0x8] sm:$0xff]   ;;  %4244 = vmatpush3.bf16.msra.mxu1 %v4634_v1  ;;  %v4637_v4 = vld [vmem:[%s5903_s30 + $0x10] sm:$0xff]   ;;  %1169 = vst.msk [vmem:[#allocation4 + $0x10] sm:$0xff] %vm1166_vm1, %v5028_v10 }
  0x99   : > { %4227 = vmatprep.mubr.msk.bf16.mxu0 %vm778_vm0, %v4635_v2  ;;  %4245 = vmatprep.mubr.msk.bf16.mxu1 %vm778_vm0, %v4635_v2  ;;  %v4638_v5 = vld [vmem:[%s5903_s30 + $0x18] sm:$0xff]   ;;  %v4639_v6 = vld [vmem:[%s5903_s30 + $0x20] sm:$0xff]   ;;  %v4640_v7 = vld [vmem:[%s5903_s30 + $0x28] sm:$0xff]   ;;  %1170 = vst.msk [vmem:[#allocation4 + $0x18] sm:$0xff] %vm1166_vm1, %v5028_v10 }
  0x9a   : > { %v4641_v8 = vld [vmem:[%s5903_s30 + $0x30] sm:$0xff]   ;;  %v4642_v9 = vld [vmem:[%s5903_s30 + $0x38] sm:$0xff]   ;;  %1171 = vst.msk [vmem:[#allocation4 + $0x20] sm:$0xff] %vm1166_vm1, %v5028_v10  ;;  %1172 = vst.msk [vmem:[#allocation4 + $0x28] sm:$0xff] %vm1166_vm1, %v5028_v10 }
  0x9b   : > { %4228 = vmatmul.mubr.msk.bf16.vlgmr.msra.gmra.mxu0 %vm778_vm0, %v4636_v3  ;;  %4246 = vmatmul.mubr.msk.bf16.vlgmr.msra.gmra.mxu1 %vm778_vm0, %v4636_v3  ;;  %1173 = vst.msk [vmem:[#allocation4 + $0x30] sm:$0xff] %vm1166_vm1, %v5028_v10  ;;  %1174 = vst.msk [vmem:[#allocation4 + $0x38] sm:$0xff] %vm1166_vm1, %v5028_v10 }
  0x9c   : > { %4231 = vmatprep.mubr.msk.bf16.mxu0 %vm778_vm0, %v4637_v4  ;;  %4249 = vmatprep.mubr.msk.bf16.mxu1 %vm778_vm0, %v4637_v4  ;;  %1175 = vst.msk [vmem:[#allocation4 + $0x40] sm:$0xff] %vm1166_vm1, %v5028_v10  ;;  %1176 = vst.msk [vmem:[#allocation4 + $0x48] sm:$0xff] %vm1166_vm1, %v5028_v10 }
  0x9d   : > { %1177 = vst.msk [vmem:[#allocation4 + $0x50] sm:$0xff] %vm1166_vm1, %v5028_v10  ;;  %1178 = vst.msk [vmem:[#allocation4 + $0x58] sm:$0xff] %vm1166_vm1, %v5028_v10 }
  0x9e   : > { %1179 = vst.msk [vmem:[#allocation4 + $0x60] sm:$0xff] %vm1166_vm1, %v5028_v10  ;;  %1180 = vst.msk [vmem:[#allocation4 + $0x68] sm:$0xff] %vm1166_vm1, %v5028_v10 }
  0x9f   : > { %1181 = vst.msk [vmem:[#allocation4 + $0x70] sm:$0xff] %vm1166_vm1, %v5028_v10  ;;  %1182 = vst.msk [vmem:[#allocation4 + $0x78] sm:$0xff] %vm1166_vm1, %v5028_v10 }
  0xa3   : > { %4232 = vmatmul.mubr.msk.bf16.gmra.mxu0 %vm778_vm0, %v4638_v5  ;;  %4250 = vmatmul.mubr.msk.bf16.gmra.mxu1 %vm778_vm0, %v4638_v5 }
  0xa4   : > { %4235 = vmatprep.mubr.msk.bf16.mxu0 %vm778_vm0, %v4639_v6  ;;  %4253 = vmatprep.mubr.msk.bf16.mxu1 %vm778_vm0, %v4639_v6 }
  0xab   : > { %4236 = vmatmul.mubr.msk.bf16.gmra.mxu0 %vm778_vm0, %v4640_v7  ;;  %4254 = vmatmul.mubr.msk.bf16.gmra.mxu1 %vm778_vm0, %v4640_v7 }
  0xac   : > { %4239 = vmatprep.mubr.msk.bf16.mxu0 %vm778_vm0, %v4641_v8  ;;  %4257 = vmatprep.mubr.msk.bf16.mxu1 %vm778_vm0, %v4641_v8 }
  0xb3   : > { %4240 = vmatmul.mubr.msk.bf16.gmra.mxu0 %vm778_vm0, %v4642_v9  ;;  %4258 = vmatmul.mubr.msk.bf16.gmra.mxu1 %vm778_vm0, %v4642_v9 }
 0x15b   : > { %v4229_v11 = vpop.f32.mrf.mxu0  ;;  %v4247_v13 = vpop.f32.mrf.mxu1 }
 0x15c   : > { %v3994_v12 = vpack.c.bf16 %v4229_v11, %v4229_v11  ;;  %v4010_v14 = vpack.c.bf16 %v4247_v13, %v4247_v13 }
 0x15d   : > { %v837_v15 = vpop.f32.mrf.mxu0  ;;  %v1023_v17 = vpop.f32.mrf.mxu1 }
 0x15e   : > { %967 = vst.msk [vmem:[#allocation2 + $0x8] sm:$0xf] %vm964_vm2, %v3994_v12  ;;  %v3992_v16 = vpack.c.bf16 %v837_v15, %v837_v15  ;;  %1152 = vst.msk [vmem:[#allocation3 + $0x8] sm:$0xf] %vm964_vm2, %v4010_v14  ;;  %v4008_v18 = vpack.c.bf16 %v1023_v17, %v1023_v17 }
 0x15f   : > { %v4230_v19 = vpop.f32.mrf.mxu0  ;;  %v4248_v21 = vpop.f32.mrf.mxu1 }
 0x160   : > { %965 = vst.msk [vmem:[#allocation2] sm:$0xf] %vm964_vm2, %v3992_v16  ;;  %v3995_v20 = vpack.c.bf16 %v4230_v19, %v4230_v19  ;;  %1150 = vst.msk [vmem:[#allocation3] sm:$0xf] %vm964_vm2, %v4008_v18  ;;  %v4011_v22 = vpack.c.bf16 %v4248_v21, %v4248_v21 }
 0x161   : > { %v840_v23 = vpop.f32.mrf.mxu0  ;;  %v1026_v25 = vpop.f32.mrf.mxu1 }
 0x162   : > { %968 = vst.msk [vmem:[#allocation2 + $0xc] sm:$0xf] %vm964_vm2, %v3995_v20  ;;  %v3993_v24 = vpack.c.bf16 %v840_v23, %v840_v23  ;;  %1153 = vst.msk [vmem:[#allocation3 + $0xc] sm:$0xf] %vm964_vm2, %v4011_v22  ;;  %v4009_v26 = vpack.c.bf16 %v1026_v25, %v1026_v25 }
 0x163   : > { %v4233_v27 = vpop.f32.mrf.mxu0  ;;  %v4251_v29 = vpop.f32.mrf.mxu1 }
 0x164   : > { %966 = vst.msk [vmem:[#allocation2 + $0x4] sm:$0xf] %vm964_vm2, %v3993_v24  ;;  %v3998_v28 = vpack.c.bf16 %v4233_v27, %v4233_v27  ;;  %1151 = vst.msk [vmem:[#allocation3 + $0x4] sm:$0xf] %vm964_vm2, %v4009_v26  ;;  %v4014_v30 = vpack.c.bf16 %v4251_v29, %v4251_v29 }
 0x165   : > { %v853_v31 = vpop.f32.mrf.mxu0  ;;  %v1039_v33 = vpop.f32.mrf.mxu1 }
 0x166   : > { %971 = vst.msk [vmem:[#allocation2 + $0x18] sm:$0xf] %vm964_vm2, %v3998_v28  ;;  %v3996_v32 = vpack.c.bf16 %v853_v31, %v853_v31  ;;  %1156 = vst.msk [vmem:[#allocation3 + $0x18] sm:$0xf] %vm964_vm2, %v4014_v30  ;;  %v4012_v34 = vpack.c.bf16 %v1039_v33, %v1039_v33 }
 0x167   : > { %v4234_v35 = vpop.f32.mrf.mxu0  ;;  %v4252_v37 = vpop.f32.mrf.mxu1 }
 0x168   : > { %969 = vst.msk [vmem:[#allocation2 + $0x10] sm:$0xf] %vm964_vm2, %v3996_v32  ;;  %v3999_v36 = vpack.c.bf16 %v4234_v35, %v4234_v35  ;;  %1154 = vst.msk [vmem:[#allocation3 + $0x10] sm:$0xf] %vm964_vm2, %v4012_v34  ;;  %v4015_v38 = vpack.c.bf16 %v4252_v37, %v4252_v37 }
 0x169   : > { %v856_v39 = vpop.f32.mrf.mxu0  ;;  %v1042_v41 = vpop.f32.mrf.mxu1 }
 0x16a   : > { %972 = vst.msk [vmem:[#allocation2 + $0x1c] sm:$0xf] %vm964_vm2, %v3999_v36  ;;  %v3997_v40 = vpack.c.bf16 %v856_v39, %v856_v39  ;;  %1157 = vst.msk [vmem:[#allocation3 + $0x1c] sm:$0xf] %vm964_vm2, %v4015_v38  ;;  %v4013_v42 = vpack.c.bf16 %v1042_v41, %v1042_v41 }
 0x16b   : > { %v4237_v43 = vpop.f32.mrf.mxu0  ;;  %v4255_v45 = vpop.f32.mrf.mxu1 }
 0x16c   : > { %970 = vst.msk [vmem:[#allocation2 + $0x14] sm:$0xf] %vm964_vm2, %v3997_v40  ;;  %v4002_v44 = vpack.c.bf16 %v4237_v43, %v4237_v43  ;;  %1155 = vst.msk [vmem:[#allocation3 + $0x14] sm:$0xf] %vm964_vm2, %v4013_v42  ;;  %v4018_v46 = vpack.c.bf16 %v4255_v45, %v4255_v45 }
 0x16d   : > { %v869_v47 = vpop.f32.mrf.mxu0  ;;  %v1055_v49 = vpop.f32.mrf.mxu1 }
 0x16e   : > { %975 = vst.msk [vmem:[#allocation2 + $0x28] sm:$0xf] %vm964_vm2, %v4002_v44  ;;  %v4000_v48 = vpack.c.bf16 %v869_v47, %v869_v47  ;;  %1160 = vst.msk [vmem:[#allocation3 + $0x28] sm:$0xf] %vm964_vm2, %v4018_v46  ;;  %v4016_v50 = vpack.c.bf16 %v1055_v49, %v1055_v49 }
 0x16f   : > { %v4238_v51 = vpop.f32.mrf.mxu0  ;;  %v4256_v53 = vpop.f32.mrf.mxu1 }
 0x170   : > { %973 = vst.msk [vmem:[#allocation2 + $0x20] sm:$0xf] %vm964_vm2, %v4000_v48  ;;  %v4003_v52 = vpack.c.bf16 %v4238_v51, %v4238_v51  ;;  %1158 = vst.msk [vmem:[#allocation3 + $0x20] sm:$0xf] %vm964_vm2, %v4016_v50  ;;  %v4019_v54 = vpack.c.bf16 %v4256_v53, %v4256_v53 }
 0x171   : > { %v872_v55 = vpop.f32.mrf.mxu0  ;;  %v1058_v57 = vpop.f32.mrf.mxu1 }
 0x172   : > { %976 = vst.msk [vmem:[#allocation2 + $0x2c] sm:$0xf] %vm964_vm2, %v4003_v52  ;;  %v4001_v56 = vpack.c.bf16 %v872_v55, %v872_v55  ;;  %1161 = vst.msk [vmem:[#allocation3 + $0x2c] sm:$0xf] %vm964_vm2, %v4019_v54  ;;  %v4017_v58 = vpack.c.bf16 %v1058_v57, %v1058_v57 }
 0x173   : > { %v4241_v59 = vpop.f32.mrf.mxu0  ;;  %v4259_v61 = vpop.f32.mrf.mxu1 }
 0x174   : > { %974 = vst.msk [vmem:[#allocation2 + $0x24] sm:$0xf] %vm964_vm2, %v4001_v56  ;;  %v4006_v60 = vpack.c.bf16 %v4241_v59, %v4241_v59  ;;  %1159 = vst.msk [vmem:[#allocation3 + $0x24] sm:$0xf] %vm964_vm2, %v4017_v58  ;;  %v4022_v62 = vpack.c.bf16 %v4259_v61, %v4259_v61 }
 0x175   : > { %v885_v63 = vpop.f32.mrf.mxu0  ;;  %v1071_v1 = vpop.f32.mrf.mxu1 }
 0x176   : > { %979 = vst.msk [vmem:[#allocation2 + $0x38] sm:$0xf] %vm964_vm2, %v4006_v60  ;;  %v4004_v0 = vpack.c.bf16 %v885_v63, %v885_v63  ;;  %1164 = vst.msk [vmem:[#allocation3 + $0x38] sm:$0xf] %vm964_vm2, %v4022_v62  ;;  %v4020_v2 = vpack.c.bf16 %v1071_v1, %v1071_v1 }
 0x177   : > { %v4242_v3 = vpop.f32.mrf.mxu0  ;;  %v4260_v5 = vpop.f32.mrf.mxu1 }
 0x178   : > { %977 = vst.msk [vmem:[#allocation2 + $0x30] sm:$0xf] %vm964_vm2, %v4004_v0  ;;  %v4007_v4 = vpack.c.bf16 %v4242_v3, %v4242_v3  ;;  %1162 = vst.msk [vmem:[#allocation3 + $0x30] sm:$0xf] %vm964_vm2, %v4020_v2  ;;  %v4023_v6 = vpack.c.bf16 %v4260_v5, %v4260_v5 }
 0x179   : > { %v888_v7 = vpop.f32.mrf.mxu0  ;;  %v1074_v9 = vpop.f32.mrf.mxu1 }
 0x17a   : > { %980 = vst.msk [vmem:[#allocation2 + $0x3c] sm:$0xf] %vm964_vm2, %v4007_v4  ;;  %v4005_v8 = vpack.c.bf16 %v888_v7, %v888_v7  ;;  %1165 = vst.msk [vmem:[#allocation3 + $0x3c] sm:$0xf] %vm964_vm2, %v4023_v6  ;;  %v4021_v10 = vpack.c.bf16 %v1074_v9, %v1074_v9 }
 0x17c   : > { %978 = vst.msk [vmem:[#allocation2 + $0x34] sm:$0xf] %vm964_vm2, %v4005_v8  ;;  %1163 = vst.msk [vmem:[#allocation3 + $0x34] sm:$0xf] %vm964_vm2, %v4021_v10 }
 0x17d PF: > { %v4645_v13 = vld [vmem:[#allocation3 + $0x28] sm:$0xff]   ;;  %v4646_v14 = vld [vmem:[#allocation3 + $0x20] sm:$0xff]   ;;  %v4647_v17 = vld [vmem:[#allocation3 + $0x18] sm:$0xff]   ;;  %vm2017_vm3 = vcmask 261120   ;;  %vm2385_vm4 = vcmask 523264   ;;  %p3943_p8 = scmp.ne.s32.totalorder %s5144_s0, 1 }
 0x17e   : > { %v4651_v15 = vld [vmem:[%s5332_s7] sm:$0xff]   ;;  %v4648_v18 = vld [vmem:[#allocation3 + $0x10] sm:$0xff]   ;;  %v4649_v19 = vld [vmem:[#allocation3 + $0x8] sm:$0xff]   ;;  %s5904_s16 = sld [smem:[#allocation23_spill]] (!%p3943_p8) }
 0x17f   : > { %v4652_v16 = vld [vmem:[%s5332_s7 + $0x40] sm:$0xff]   ;;  %4277 = vmatprep.mubr.bf16.mxu0 %v4651_v15  ;;  %v4653_v21 = vld [vmem:[%s5332_s7 + $0x8] sm:$0xff]   ;;  %v4657_v25 = vld [vmem:[%s5332_s7 + $0x10] sm:$0xff]   ;;  %s5905_s28 = sld [smem:[#allocation28_spill]] (!%p3943_p8) }
 0x180   : > { %4293 = vmatprep.mubr.bf16.mxu1 %v4652_v16  ;;  %v4650_v20 = vld [vmem:[#allocation3] sm:$0xff]   ;;  %v4654_v23 = vld [vmem:[%s5332_s7 + $0x48] sm:$0xff]   ;;  %v4674_v26 = vld [vmem:[#allocation11 + $0x8] sm:$0xff]  }
 0x181   : > { %v4643_v11 = vld [vmem:[#allocation3 + $0x38] sm:$0xff]   ;;  %v4658_v27 = vld [vmem:[%s5332_s7 + $0x50] sm:$0xff]   ;;  %v4661_v30 = vld [vmem:[#allocation2 + $0x28] sm:$0xff]  }
 0x182   : > { %4261 = vmatprep.subr.bf16.mxu0 %v4643_v11  ;;  %4499 = vmatprep.subr.bf16.mxu1 %v4643_v11  ;;  %v4655_v22 = vld [vmem:[#allocation2 + $0x38] sm:$0xff]   ;;  %v4676_v28 = vld [vmem:[#allocation11] sm:$0xff]   ;;  %v4662_v32 = vld [vmem:[#allocation2 + $0x20] sm:$0xff]  }
 0x183   : > { %v4644_v12 = vld [vmem:[#allocation3 + $0x30] sm:$0xff]   ;;  %4262 = vmatpush3.bf16.msra.mxu0 %v4643_v11  ;;  %4507 = vmatpush3.bf16.msra.mxu1 %v4643_v11  ;;  %v4659_v29 = vld [vmem:[%s5332_s7 + $0x18] sm:$0xff]   ;;  %v4663_v33 = vld [vmem:[%s5332_s7 + $0x20] sm:$0xff]  }
 0x184   : > { %4263 = vmatprep.subr.bf16.mxu0 %v4644_v12  ;;  %4500 = vmatprep.subr.bf16.mxu1 %v4644_v12  ;;  %v4656_v24 = vld [vmem:[#allocation2 + $0x30] sm:$0xff]   ;;  %v4660_v31 = vld [vmem:[%s5332_s7 + $0x58] sm:$0xff]   ;;  %v4664_v34 = vld [vmem:[%s5332_s7 + $0x60] sm:$0xff]  }
 0x185   : > { %v4665_v35 = vld [vmem:[%s5332_s7 + $0x28] sm:$0xff]   ;;  %v4667_v36 = vld [vmem:[#allocation2 + $0x18] sm:$0xff]   ;;  %v4668_v38 = vld [vmem:[#allocation2 + $0x10] sm:$0xff]  }
 0x186   : > { %v4666_v37 = vld [vmem:[%s5332_s7 + $0x68] sm:$0xff]   ;;  %v4669_v39 = vld [vmem:[%s5332_s7 + $0x30] sm:$0xff]   ;;  %v4671_v41 = vld [vmem:[%s5332_s7 + $0x38] sm:$0xff]  }
 0x187   : > { %4264 = vmatpush3.bf16.msra.mxu0 %v4644_v12  ;;  %4508 = vmatpush3.bf16.msra.mxu1 %v4644_v12  ;;  %v4670_v40 = vld [vmem:[%s5332_s7 + $0x70] sm:$0xff]   ;;  %v4673_v42 = vld [vmem:[#allocation2 + $0x8] sm:$0xff]   ;;  %v4672_v43 = vld [vmem:[%s5332_s7 + $0x78] sm:$0xff]  }
 0x188   : > { %4265 = vmatprep.subr.bf16.mxu0 %v4645_v13  ;;  %4501 = vmatprep.subr.bf16.mxu1 %v4645_v13  ;;  %v4675_v44 = vld [vmem:[#allocation2] sm:$0xff]   ;;  %v4679_v47 = vld [vmem:[%s5327_s27 + $0x8] sm:$0xff]   ;;  %v4681_v49 = vld [vmem:[%s5327_s27 + $0x10] sm:$0xff]  }
 0x189   : > { %v4677_v45 = vld [vmem:[%s5327_s27] sm:$0xff]   ;;  %v4680_v48 = vld [vmem:[%s5322_s20 + $0x8] sm:$0xff]   ;;  %v4682_v50 = vld [vmem:[%s5322_s20 + $0x10] sm:$0xff]  }
 0x18a   : > { %v4678_v46 = vld [vmem:[%s5322_s20] sm:$0xff]   ;;  %v4683_v51 = vld [vmem:[%s5327_s27 + $0x18] sm:$0xff]   ;;  %v4687_v55 = vld [vmem:[%s5327_s27 + $0x28] sm:$0xff]  }
 0x18b   : > { %4266 = vmatpush3.bf16.msra.mxu0 %v4645_v13  ;;  %4509 = vmatpush3.bf16.msra.mxu1 %v4645_v13  ;;  %v4684_v52 = vld [vmem:[%s5322_s20 + $0x18] sm:$0xff]   ;;  %v4685_v53 = vld [vmem:[%s5327_s27 + $0x20] sm:$0xff]   ;;  %v4688_v56 = vld [vmem:[%s5322_s20 + $0x28] sm:$0xff]  }
 0x18c   : > { %4267 = vmatprep.subr.bf16.mxu0 %v4646_v14  ;;  %4502 = vmatprep.subr.bf16.mxu1 %v4646_v14  ;;  %v4686_v54 = vld [vmem:[%s5322_s20 + $0x20] sm:$0xff]   ;;  %v4689_v57 = vld [vmem:[%s5327_s27 + $0x30] sm:$0xff]   ;;  %v4691_v59 = vld [vmem:[%s5327_s27 + $0x38] sm:$0xff]  }
 0x18d   : > { %v4690_v58 = vld [vmem:[%s5322_s20 + $0x30] sm:$0xff]   ;;  %v4692_v60 = vld [vmem:[%s5322_s20 + $0x38] sm:$0xff]   ;;  %v4693_v61 = vld [vmem:[%s5327_s27 + $0x40] sm:$0xff]  }
 0x18e   : > { %v4694_v62 = vld [vmem:[%s5322_s20 + $0x40] sm:$0xff]   ;;  %v4695_v63 = vld [vmem:[%s5327_s27 + $0x48] sm:$0xff]   ;;  %v4697_v1 = vld [vmem:[%s5327_s27 + $0x50] sm:$0xff]  }
 0x18f   : > { %4268 = vmatpush3.bf16.msra.mxu0 %v4646_v14  ;;  %4510 = vmatpush3.bf16.msra.mxu1 %v4646_v14  ;;  %v4696_v0 = vld [vmem:[%s5322_s20 + $0x48] sm:$0xff]   ;;  %v4698_v2 = vld [vmem:[%s5322_s20 + $0x50] sm:$0xff]   ;;  %v4699_v3 = vld [vmem:[%s5327_s27 + $0x58] sm:$0xff]  }
 0x190   : > { %4269 = vmatprep.subr.bf16.mxu0 %v4647_v17  ;;  %4503 = vmatprep.subr.bf16.mxu1 %v4647_v17  ;;  %v4700_v4 = vld [vmem:[%s5322_s20 + $0x58] sm:$0xff]   ;;  %v4701_v5 = vld [vmem:[%s5327_s27 + $0x60] sm:$0xff]   ;;  %v4703_v7 = vld [vmem:[%s5327_s27 + $0x68] sm:$0xff]  }
 0x191   : > { %v4702_v6 = vld [vmem:[%s5322_s20 + $0x60] sm:$0xff]   ;;  %v4704_v8 = vld [vmem:[%s5322_s20 + $0x68] sm:$0xff]   ;;  %v4705_v9 = vld [vmem:[%s5327_s27 + $0x70] sm:$0xff]  }
 0x192   : > { %v4706_v10 = vld [vmem:[%s5322_s20 + $0x70] sm:$0xff]   ;;  %v4709_v11 = vld [vmem:[#allocation13 + $0x18] sm:$0xff]   ;;  %v4711_v15 = vld [vmem:[#allocation13 + $0x8] sm:$0xff]  }
 0x193   : > { %4270 = vmatpush3.bf16.msra.mxu0 %v4647_v17  ;;  %4511 = vmatpush3.bf16.msra.mxu1 %v4647_v17  ;;  %v4707_v12 = vld [vmem:[%s5327_s27 + $0x78] sm:$0xff]   ;;  %v4710_v14 = vld [vmem:[#allocation13 + $0x10] sm:$0xff]   ;;  %v4712_v16 = vld [vmem:[#allocation13] sm:$0xff]  }
 0x194   : > { %4271 = vmatprep.subr.bf16.mxu0 %v4648_v18  ;;  %4504 = vmatprep.subr.bf16.mxu1 %v4648_v18  ;;  %v4708_v13 = vld [vmem:[%s5322_s20 + $0x78] sm:$0xff]  }
 0x197   : > { %4272 = vmatpush3.bf16.msra.mxu0 %v4648_v18  ;;  %4512 = vmatpush3.bf16.msra.mxu1 %v4648_v18 }
 0x198   : > { %4273 = vmatprep.subr.bf16.mxu0 %v4649_v19  ;;  %4505 = vmatprep.subr.bf16.mxu1 %v4649_v19 }
 0x19b   : > { %4274 = vmatpush3.bf16.msra.mxu0 %v4649_v19  ;;  %4513 = vmatpush3.bf16.msra.mxu1 %v4649_v19 }
 0x19c   : > { %4275 = vmatprep.subr.bf16.mxu0 %v4650_v20  ;;  %4506 = vmatprep.subr.bf16.mxu1 %v4650_v20 }
 0x19f   : > { %4276 = vmatpush3.bf16.msra.mxu0 %v4650_v20  ;;  %4514 = vmatpush3.bf16.msra.mxu1 %v4650_v20 }
 0x1a0   : > { %4309 = vmatprep.subr.bf16.mxu1 %v4655_v22  ;;  %4357 = vmatprep.subr.bf16.mxu0 %v4674_v26 }
 0x1a2   : > { %4278 = vmatmul.mubr.bf16.vlgmr.msra.gmra.mxu0 %v4653_v21  ;;  %4294 = vmatmul.mubr.bf16.vlgmr.msra.gmra.mxu1 %v4654_v23 }
 0x1a3   : > { %4310 = vmatpush3.bf16.msra.mxu1 %v4655_v22  ;;  %4281 = vmatprep.mubr.bf16.mxu0 %v4657_v25 }
 0x1a4   : > { %4311 = vmatprep.subr.bf16.mxu1 %v4656_v24  ;;  %4297 = vmatprep.mubr.bf16.mxu1 %v4658_v27 }
 0x1a5   : > { %4358 = vmatpush3.bf16.msra.mxu0 %v4674_v26 }
 0x1a6   : > { %4359 = vmatprep.subr.bf16.mxu0 %v4676_v28 }
 0x1a7   : > { %4312 = vmatpush3.bf16.msra.mxu1 %v4656_v24 }
 0x1a8   : > { %4313 = vmatprep.subr.bf16.mxu1 %v4661_v30 }
 0x1a9   : > { %4360 = vmatpush3.bf16.msra.mxu0 %v4676_v28 }
 0x1aa   : > { %4282 = vmatmul.mubr.bf16.gmra.mxu0 %v4659_v29  ;;  %4298 = vmatmul.mubr.bf16.gmra.mxu1 %v4660_v31 }
 0x1ab   : > { %4314 = vmatpush3.bf16.msra.mxu1 %v4661_v30  ;;  %4285 = vmatprep.mubr.bf16.mxu0 %v4663_v33 }
 0x1ac   : > { %4315 = vmatprep.subr.bf16.mxu1 %v4662_v32  ;;  %4301 = vmatprep.mubr.bf16.mxu1 %v4664_v34 }
 0x1af   : > { %4316 = vmatpush3.bf16.msra.mxu1 %v4662_v32 }
 0x1b0   : > { %4317 = vmatprep.subr.bf16.mxu1 %v4667_v36 }
 0x1b2   : > { %4286 = vmatmul.mubr.bf16.gmra.mxu0 %v4665_v35  ;;  %4302 = vmatmul.mubr.bf16.gmra.mxu1 %v4666_v37 }
 0x1b3   : > { %4318 = vmatpush3.bf16.msra.mxu1 %v4667_v36  ;;  %4289 = vmatprep.mubr.bf16.mxu0 %v4669_v39 }
 0x1b4   : > { %4319 = vmatprep.subr.bf16.mxu1 %v4668_v38  ;;  %4305 = vmatprep.mubr.bf16.mxu1 %v4670_v40 }
 0x1b7   : > { %4320 = vmatpush3.bf16.msra.mxu1 %v4668_v38 }
 0x1b8   : > { %4321 = vmatprep.subr.bf16.mxu1 %v4673_v42 }
 0x1ba   : > { %4290 = vmatmul.mubr.bf16.gmra.mxu0 %v4671_v41  ;;  %4306 = vmatmul.mubr.bf16.gmra.mxu1 %v4672_v43 }
 0x1bb   : > { %4322 = vmatpush3.bf16.msra.mxu1 %v4673_v42  ;;  %4325 = vmatprep.mubr.bf16.mxu1 %v4677_v45 }
 0x1bc   : > { %4323 = vmatprep.subr.bf16.mxu1 %v4675_v44  ;;  %4361 = vmatprep.mubr.msk.bf16.mxu0 %vm2017_vm3, %v4678_v46 }
 0x1bf   : > { %4324 = vmatpush3.bf16.msra.mxu1 %v4675_v44 }
 0x1c0   : > { %4393 = vmatprep.subr.bf16.mxu1 %v4709_v11 }
 0x1c2   : > { %4326 = vmatmul.mubr.bf16.vlgmr.msra.gmra.mxu1 %v4679_v47  ;;  %4362 = vmatmul.mubr.msk.bf16.vlgmr.msra.gmra.mxu0 %vm2017_vm3, %v4680_v48 }
 0x1c3   : > { %4329 = vmatprep.mubr.bf16.mxu1 %v4681_v49  ;;  %4365 = vmatprep.mubr.msk.bf16.mxu0 %vm2017_vm3, %v4682_v50 }
 0x1c4   : > { %4394 = vmatpush3.bf16.msra.mxu1 %v4709_v11 }
 0x1c5   : > { %4395 = vmatprep.subr.bf16.mxu1 %v4710_v14 }
 0x1c8   : > { %4396 = vmatpush3.bf16.msra.mxu1 %v4710_v14 }
 0x1c9   : > { %4397 = vmatprep.subr.bf16.mxu1 %v4711_v15 }
 0x1ca   : > { %4330 = vmatmul.mubr.bf16.gmra.mxu1 %v4683_v51  ;;  %4366 = vmatmul.mubr.msk.bf16.gmra.mxu0 %vm2017_vm3, %v4684_v52 }
 0x1cb   : > { %4333 = vmatprep.mubr.bf16.mxu1 %v4685_v53  ;;  %4369 = vmatprep.mubr.msk.bf16.mxu0 %vm2017_vm3, %v4686_v54 }
 0x1cc   : > { %4398 = vmatpush3.bf16.msra.mxu1 %v4711_v15 }
 0x1cd   : > { %4399 = vmatprep.subr.bf16.mxu1 %v4712_v16 }
 0x1d0   : > { %4400 = vmatpush3.bf16.msra.mxu1 %v4712_v16 }
 0x1d2   : > { %4334 = vmatmul.mubr.bf16.gmra.mxu1 %v4687_v55  ;;  %4370 = vmatmul.mubr.msk.bf16.gmra.mxu0 %vm2017_vm3, %v4688_v56 }
 0x1d3   : > { %4337 = vmatprep.mubr.bf16.mxu1 %v4689_v57  ;;  %4373 = vmatprep.mubr.msk.bf16.mxu0 %vm2017_vm3, %v4690_v58 }
 0x1da   : > { %4338 = vmatmul.mubr.bf16.gmra.mxu1 %v4691_v59  ;;  %4374 = vmatmul.mubr.msk.bf16.gmra.mxu0 %vm2017_vm3, %v4692_v60 }
 0x1db   : > { %4341 = vmatprep.mubr.bf16.mxu1 %v4693_v61  ;;  %4377 = vmatprep.mubr.msk.bf16.mxu0 %vm2017_vm3, %v4694_v62  ;;  %v5539_v62 = vld [vmem:[%s5864_s9] ss:$0 sm:$0xff] }
 0x1e2   : > { %4342 = vmatmul.mubr.bf16.gmra.mxu1 %v4695_v63  ;;  %4378 = vmatmul.mubr.msk.bf16.gmra.mxu0 %vm2017_vm3, %v4696_v0 }
 0x1e3   : > { %4345 = vmatprep.mubr.bf16.mxu1 %v4697_v1  ;;  %4381 = vmatprep.mubr.msk.bf16.mxu0 %vm2017_vm3, %v4698_v2 }
 0x1ea   : > { %4346 = vmatmul.mubr.bf16.gmra.mxu1 %v4699_v3  ;;  %4382 = vmatmul.mubr.msk.bf16.gmra.mxu0 %vm2017_vm3, %v4700_v4 }
 0x1eb   : > { %4349 = vmatprep.mubr.bf16.mxu1 %v4701_v5  ;;  %4385 = vmatprep.mubr.msk.bf16.mxu0 %vm2017_vm3, %v4702_v6 }
 0x1f2   : > { %4350 = vmatmul.mubr.bf16.gmra.mxu1 %v4703_v7  ;;  %4386 = vmatmul.mubr.msk.bf16.gmra.mxu0 %vm2017_vm3, %v4704_v8 }
 0x1f3   : > { %4353 = vmatprep.mubr.bf16.mxu1 %v4705_v9  ;;  %4389 = vmatprep.mubr.msk.bf16.mxu0 %vm2017_vm3, %v4706_v10 }
 0x1fa   : > { %4354 = vmatmul.mubr.bf16.gmra.mxu1 %v4707_v12  ;;  %4390 = vmatmul.mubr.msk.bf16.gmra.mxu0 %vm2017_vm3, %v4708_v13 }
 0x262   : > { %v4279_v17 = vpop.f32.mrf.mxu0  ;;  %v5488_v18 = vpop.f32.mrf.mxu1 }
 0x264   : > { %v1457_v19 = vpop.f32.mrf.mxu0  ;;  %v5490_v20 = vpop.f32.mrf.mxu1 }
 0x266   : > { %v4280_v21 = vpop.f32.mrf.mxu0  ;;  %v5492_v22 = vpop.f32.mrf.mxu1 }
 0x268   : > { %v1460_v23 = vpop.f32.mrf.mxu0  ;;  %v5494_v24 = vpop.f32.mrf.mxu1 }
 0x26a   : > { %v4283_v25 = vpop.f32.mrf.mxu0  ;;  %v5496_v26 = vpop.f32.mrf.mxu1 }
 0x26c   : > { %v1473_v27 = vpop.f32.mrf.mxu0  ;;  %v5498_v28 = vpop.f32.mrf.mxu1 }
 0x26e   : > { %v4284_v29 = vpop.f32.mrf.mxu0  ;;  %v5500_v30 = vpop.f32.mrf.mxu1 }
 0x270   : > { %v1476_v31 = vpop.f32.mrf.mxu0  ;;  %v5502_v32 = vpop.f32.mrf.mxu1 }
 0x272   : > { %v5504_v33 = vpop.f32.mrf.mxu0  ;;  %v5506_v34 = vpop.f32.mrf.mxu1 }
 0x274   : > { %v5508_v35 = vpop.f32.mrf.mxu0  ;;  %v5510_v36 = vpop.f32.mrf.mxu1 }
 0x276   : > { %v5512_v37 = vpop.f32.mrf.mxu0  ;;  %v5514_v38 = vpop.f32.mrf.mxu1 }
 0x278   : > { %v5516_v39 = vpop.f32.mrf.mxu0  ;;  %v5518_v40 = vpop.f32.mrf.mxu1 }
 0x27a   : > { %v5520_v41 = vpop.f32.mrf.mxu0  ;;  %v5522_v42 = vpop.f32.mrf.mxu1 }
 0x27c   : > { %v5524_v43 = vpop.f32.mrf.mxu0  ;;  %v5526_v44 = vpop.f32.mrf.mxu1 }
 0x27e   : > { %v5528_v45 = vpop.f32.mrf.mxu0  ;;  %v5530_v46 = vpop.f32.mrf.mxu1 }
 0x280   : > { %v5532_v47 = vpop.f32.mrf.mxu0  ;;  %v5534_v48 = vpop.f32.mrf.mxu1 }
 0x282   : > { %v4327_v49 = vpop.f32.mrf.mxu1  ;;  %v4363_v50 = vpop.f32.mrf.mxu0 }
 0x283   : > { %v1771_v51 = vadd.f32 %v4327_v49, %v4279_v17 }
 0x284   : > { %v1762_v52 = vpop.f32.mrf.mxu1  ;;  %v2100_v53 = vpop.f32.mrf.mxu0 }
 0x285   : > { %v1763_v54 = vadd.f32 %v1762_v52, %v1457_v19  ;;  %v2229_v59 = vadd.f32 %v4363_v50, %v1771_v51 }
 0x286   : > { %v4328_v55 = vpop.f32.mrf.mxu1  ;;  %v4364_v56 = vpop.f32.mrf.mxu0 }
 0x287   : > { %v2227_v57 = vadd.f32 %v2100_v53, %v1763_v54  ;;  %v1774_v58 = vadd.f32 %v4328_v55, %v4280_v21  ;;  %v2268_v6 = vadd.f32 %v5539_v62, %v2229_v59 }
 0x288   : > { %v1765_v60 = vpop.f32.mrf.mxu1  ;;  %v2103_v61 = vpop.f32.mrf.mxu0 }
 0x289   : > { %v2230_v63 = vadd.f32 %v4364_v56, %v1774_v58  ;;  %v1766_v0 = vadd.f32 %v1765_v60, %v1460_v23  ;;  %v2266_v3 = vadd.f32 %v5539_v62, %v2227_v57  ;;  %v2300_v19 = vmax.f32 %v2268_v6, 0.0 }
 0x28a   : > { %v4331_v1 = vpop.f32.mrf.mxu1  ;;  %v4367_v2 = vpop.f32.mrf.mxu0 }
 0x28b   : > { %v2269_v4 = vadd.f32 %v5539_v62, %v2230_v63  ;;  %v2228_v5 = vadd.f32 %v2103_v61, %v1766_v0  ;;  %v1787_v7 = vadd.f32 %v4331_v1, %v4283_v25  ;;  %v2298_v15 = vmax.f32 %v2266_v3, 0.0 }
 0x28c   : > { %v1778_v8 = vpop.f32.mrf.mxu1  ;;  %v2116_v9 = vpop.f32.mrf.mxu0 }
 0x28d   : > { %v2267_v10 = vadd.f32 %v5539_v62, %v2228_v5  ;;  %v1779_v11 = vadd.f32 %v1778_v8, %v1473_v27  ;;  %v2301_v12 = vmax.f32 %v2269_v4, 0.0  ;;  %v2233_v21 = vadd.f32 %v4367_v2, %v1787_v7 }
 0x28e   : > { %v4332_v13 = vpop.f32.mrf.mxu1  ;;  %v4368_v14 = vpop.f32.mrf.mxu0 }
 0x28f   : > { %v2299_v16 = vmax.f32 %v2267_v10, 0.0  ;;  %v2231_v17 = vadd.f32 %v2116_v9, %v1779_v11  ;;  %v1790_v23 = vadd.f32 %v4332_v13, %v4284_v29  ;;  %v2331_v25 = vpack.c.bf16 %v2301_v12, %v2300_v19 }
 0x290   : > { %v1781_v49 = vpop.f32.mrf.mxu1  ;;  %v2119_v50 = vpop.f32.mrf.mxu0  ;;  %v2272_v57 = vadd.f32 %v5539_v62, %v2233_v21 }
 0x291   : > { %v2330_v51 = vpack.c.bf16 %v2299_v16, %v2298_v15  ;;  %v1782_v52 = vadd.f32 %v1781_v49, %v1476_v31  ;;  %v2234_v53 = vadd.f32 %v4368_v14, %v1790_v23  ;;  %v2270_v27 = vadd.f32 %v5539_v62, %v2231_v17 }
 0x292   : > { %v4335_v54 = vpop.f32.mrf.mxu1  ;;  %v4371_v55 = vpop.f32.mrf.mxu0  ;;  %v2304_v5 = vmax.f32 %v2272_v57, 0.0 }
 0x293   : > { %v2232_v56 = vadd.f32 %v2119_v50, %v1782_v52  ;;  %4401 = vmatprep.mubr.msk.bf16.mxu1 %vm2385_vm4, %v2330_v51  ;;  %v2273_v58 = vadd.f32 %v5539_v62, %v2234_v53  ;;  %v1803_v29 = vadd.f32 %v4335_v54, %v5504_v33  ;;  %v2302_v2 = vmax.f32 %v2270_v27, 0.0 }
 0x294   : > { %v1794_v59 = vpop.f32.mrf.mxu1  ;;  %v2132_v60 = vpop.f32.mrf.mxu0  ;;  %4402 = vmatmul.mubr.msk.bf16.vlgmr.msra.gmra.mxu1 %vm2385_vm4, %v2331_v25 }
 0x295   : > { %v2271_v31 = vadd.f32 %v5539_v62, %v2232_v56  ;;  %v1795_v61 = vadd.f32 %v1794_v59, %v5508_v35  ;;  %v2305_v63 = vmax.f32 %v2273_v58, 0.0  ;;  %v2237_v6 = vadd.f32 %v4371_v55, %v1803_v29 }
 0x296   : > { %v4336_v0 = vpop.f32.mrf.mxu1  ;;  %v4372_v1 = vpop.f32.mrf.mxu0 }
 0x297   : > { %v2303_v3 = vmax.f32 %v2271_v31, 0.0  ;;  %v1806_v4 = vadd.f32 %v4336_v0, %v5512_v37  ;;  %v2235_v7 = vadd.f32 %v2132_v60, %v1795_v61  ;;  %v2333_v11 = vpack.c.bf16 %v2305_v63, %v2304_v5 }
 0x298   : > { %v1797_v8 = vpop.f32.mrf.mxu1  ;;  %v2135_v33 = vpop.f32.mrf.mxu0  ;;  %v2276_v15 = vadd.f32 %v5539_v62, %v2237_v6 }
 0x299   : > { %v2332_v9 = vpack.c.bf16 %v2303_v3, %v2302_v2  ;;  %v2238_v10 = vadd.f32 %v4372_v1, %v1806_v4  ;;  %v1798_v12 = vadd.f32 %v1797_v8, %v5516_v39  ;;  %v2274_v37 = vadd.f32 %v5539_v62, %v2235_v7 }
 0x29a   : > { %v4339_v13 = vpop.f32.mrf.mxu1  ;;  %v4375_v14 = vpop.f32.mrf.mxu0  ;;  %v2308_v53 = vmax.f32 %v2276_v15, 0.0 }
 0x29b   : > { %v2277_v35 = vadd.f32 %v5539_v62, %v2238_v10  ;;  %4405 = vmatprep.mubr.msk.bf16.mxu1 %vm2385_vm4, %v2332_v9  ;;  %v2236_v16 = vadd.f32 %v2135_v33, %v1798_v12  ;;  %v1819_v21 = vadd.f32 %v4339_v13, %v5520_v41  ;;  %v2306_v54 = vmax.f32 %v2274_v37, 0.0 }
 0x29c   : > { %v1810_v17 = vpop.f32.mrf.mxu1  ;;  %v2148_v19 = vpop.f32.mrf.mxu0  ;;  %4406 = vmatmul.mubr.msk.bf16.gmra.mxu1 %vm2385_vm4, %v2333_v11 }
 0x29d   : > { %v1811_v23 = vadd.f32 %v1810_v17, %v5524_v43  ;;  %v2309_v39 = vmax.f32 %v2277_v35, 0.0  ;;  %v2275_v49 = vadd.f32 %v5539_v62, %v2236_v16  ;;  %v2241_v57 = vadd.f32 %v4375_v14, %v1819_v21 }
 0x29e   : > { %v4340_v50 = vpop.f32.mrf.mxu1  ;;  %v4376_v51 = vpop.f32.mrf.mxu0 }
 0x29f   : > { %v2239_v52 = vadd.f32 %v2148_v19, %v1811_v23  ;;  %v1822_v25 = vadd.f32 %v4340_v50, %v5528_v45  ;;  %v2307_v55 = vmax.f32 %v2275_v49, 0.0  ;;  %v2335_v41 = vpack.c.bf16 %v2309_v39, %v2308_v53 }
 0x2a0   : > { %v1813_v27 = vpop.f32.mrf.mxu1  ;;  %v2151_v56 = vpop.f32.mrf.mxu0  ;;  %v2280_v2 = vadd.f32 %v5539_v62, %v2241_v57 }
 0x2a1   : > { %v2242_v58 = vadd.f32 %v4376_v51, %v1822_v25  ;;  %v1814_v29 = vadd.f32 %v1813_v27, %v5532_v47  ;;  %v2334_v59 = vpack.c.bf16 %v2307_v55, %v2306_v54  ;;  %v2278_v31 = vadd.f32 %v5539_v62, %v2239_v52 }
 0x2a2   : > { %v4343_v43 = vpop.f32.mrf.mxu1  ;;  %v4379_v60 = vpop.f32.mrf.mxu0  ;;  %v2312_v12 = vmax.f32 %v2280_v2, 0.0 }
 0x2a3   : > { %v2281_v61 = vadd.f32 %v5539_v62, %v2242_v58  ;;  %v2240_v63 = vadd.f32 %v2151_v56, %v1814_v29  ;;  %v1835_v45 = vadd.f32 %v4343_v43, %v5488_v18  ;;  %4409 = vmatprep.mubr.msk.bf16.mxu1 %vm2385_vm4, %v2334_v59  ;;  %v2310_v7 = vmax.f32 %v2278_v31, 0.0 }
 0x2a4   : > { %v1826_v0 = vpop.f32.mrf.mxu1  ;;  %v2164_v1 = vpop.f32.mrf.mxu0  ;;  %4410 = vmatmul.mubr.msk.bf16.gmra.mxu1 %vm2385_vm4, %v2335_v41 }
 0x2a5   : > { %v2279_v3 = vadd.f32 %v5539_v62, %v2240_v63  ;;  %v1827_v47 = vadd.f32 %v1826_v0, %v5490_v20  ;;  %v2245_v4 = vadd.f32 %v4379_v60, %v1835_v45  ;;  %v2313_v8 = vmax.f32 %v2281_v61, 0.0 }
 0x2a6   : > { %v4344_v5 = vpop.f32.mrf.mxu1  ;;  %v4380_v6 = vpop.f32.mrf.mxu0 }
 0x2a7   : > { %v2311_v33 = vmax.f32 %v2279_v3, 0.0  ;;  %v2243_v9 = vadd.f32 %v2164_v1, %v1827_v47  ;;  %v1838_v18 = vadd.f32 %v4344_v5, %v5492_v22  ;;  %v2284_v35 = vadd.f32 %v5539_v62, %v2245_v4 }
 0x2a8   : > { %v1829_v10 = vpop.f32.mrf.mxu1  ;;  %v2167_v11 = vpop.f32.mrf.mxu0  ;;  %v2337_v16 = vpack.c.bf16 %v2313_v8, %v2312_v12 }
 0x2a9   : > { %v2336_v13 = vpack.c.bf16 %v2311_v33, %v2310_v7  ;;  %v1830_v14 = vadd.f32 %v1829_v10, %v5494_v24  ;;  %v2246_v20 = vadd.f32 %v4380_v6, %v1838_v18  ;;  %v2282_v17 = vadd.f32 %v5539_v62, %v2243_v9 }
 0x2aa   : > { %v4347_v15 = vpop.f32.mrf.mxu1  ;;  %v4383_v37 = vpop.f32.mrf.mxu0  ;;  %v2316_v51 = vmax.f32 %v2284_v35, 0.0 }
 0x2ab   : > { %v2244_v19 = vadd.f32 %v2167_v11, %v1830_v14  ;;  %v1851_v21 = vadd.f32 %v4347_v15, %v5496_v26  ;;  %4413 = vmatprep.mubr.msk.bf16.mxu1 %vm2385_vm4, %v2336_v13  ;;  %v2285_v22 = vadd.f32 %v5539_v62, %v2246_v20  ;;  %v2314_v54 = vmax.f32 %v2282_v17, 0.0 }
 0x2ac   : > { %v1842_v23 = vpop.f32.mrf.mxu1  ;;  %v2180_v39 = vpop.f32.mrf.mxu0  ;;  %4414 = vmatmul.mubr.msk.bf16.gmra.mxu1 %vm2385_vm4, %v2337_v16 }
 0x2ad   : > { %v2283_v49 = vadd.f32 %v5539_v62, %v2244_v19  ;;  %v2249_v24 = vadd.f32 %v4383_v37, %v1851_v21  ;;  %v1843_v50 = vadd.f32 %v1842_v23, %v5498_v28  ;;  %v2317_v52 = vmax.f32 %v2285_v22, 0.0 }
 0x2ae   : > { %v4348_v25 = vpop.f32.mrf.mxu1  ;;  %v4384_v53 = vpop.f32.mrf.mxu0 }
 0x2af   : > { %v2315_v55 = vmax.f32 %v2283_v49, 0.0  ;;  %v1854_v26 = vadd.f32 %v4348_v25, %v5500_v30  ;;  %v2339_v27 = vpack.c.bf16 %v2317_v52, %v2316_v51  ;;  %v2247_v56 = vadd.f32 %v2180_v39, %v1843_v50 }
 0x2b0   : > { %v1845_v57 = vpop.f32.mrf.mxu1  ;;  %v2183_v58 = vpop.f32.mrf.mxu0  ;;  %v2288_v41 = vadd.f32 %v5539_v62, %v2249_v24 }
 0x2b1   : > { %v2338_v29 = vpack.c.bf16 %v2315_v55, %v2314_v54  ;;  %v2250_v59 = vadd.f32 %v4384_v53, %v1854_v26  ;;  %v1846_v28 = vadd.f32 %v1845_v57, %v5502_v32  ;;  %v2286_v30 = vadd.f32 %v5539_v62, %v2247_v56 }
 0x2b2   : > { %v4351_v43 = vpop.f32.mrf.mxu1  ;;  %v4387_v60 = vpop.f32.mrf.mxu0  ;;  %v2320_v1 = vmax.f32 %v2288_v41, 0.0 }
 0x2b3   : > { %v2289_v31 = vadd.f32 %v5539_v62, %v2250_v59  ;;  %v1867_v61 = vadd.f32 %v4351_v43, %v5506_v34  ;;  %4417 = vmatprep.mubr.msk.bf16.mxu1 %vm2385_vm4, %v2338_v29  ;;  %v2248_v63 = vadd.f32 %v2183_v58, %v1846_v28  ;;  %v2318_v8 = vmax.f32 %v2286_v30, 0.0  ;;  %v4715_v28 = vld [vmem:[%s5300_s24 + $0x4] ss:$8 sps:$4 sm:$0xff]  }
 0x2b4   : > { %v1858_v45 = vpop.f32.mrf.mxu1  ;;  %v2196_v0 = vpop.f32.mrf.mxu0  ;;  %4418 = vmatmul.mubr.msk.bf16.gmra.mxu1 %vm2385_vm4, %v2339_v27  ;;  %2787 = vmatprep.mubr.bf16.mxu0 %v4715_v28 }
 0x2b5   : > { %v2321_v2 = vmax.f32 %v2289_v31, 0.0  ;;  %v2253_v3 = vadd.f32 %v4387_v60, %v1867_v61  ;;  %v1859_v47 = vadd.f32 %v1858_v45, %v5510_v36  ;;  %v2287_v32 = vadd.f32 %v5539_v62, %v2248_v63  ;;  %v5617_v60 = vld [vmem:[%s5866_s11] ss:$0 sm:$0xff] }
 0x2b6   : > { %v4352_v4 = vpop.f32.mrf.mxu1  ;;  %v4388_v5 = vpop.f32.mrf.mxu0 }
 0x2b7   : > { %v2341_v6 = vpack.c.bf16 %v2321_v2, %v2320_v1  ;;  %v2251_v34 = vadd.f32 %v2196_v0, %v1859_v47  ;;  %v1870_v7 = vadd.f32 %v4352_v4, %v5514_v38  ;;  %v2319_v33 = vmax.f32 %v2287_v32, 0.0 }
 0x2b8   : > { %v1861_v9 = vpop.f32.mrf.mxu1  ;;  %v2199_v18 = vpop.f32.mrf.mxu0  ;;  %v2292_v10 = vadd.f32 %v5539_v62, %v2253_v3 }
 0x2b9   : > { %v2254_v11 = vadd.f32 %v4388_v5, %v1870_v7  ;;  %v1862_v12 = vadd.f32 %v1861_v9, %v5518_v40  ;;  %v2340_v36 = vpack.c.bf16 %v2319_v33, %v2318_v8  ;;  %v2290_v35 = vadd.f32 %v5539_v62, %v2251_v34 }
 0x2ba   : > { %v4355_v13 = vpop.f32.mrf.mxu1  ;;  %v4391_v14 = vpop.f32.mrf.mxu0  ;;  %v2324_v17 = vmax.f32 %v2292_v10, 0.0 }
 0x2bb   : > { %v2293_v20 = vadd.f32 %v5539_v62, %v2254_v11  ;;  %v2252_v15 = vadd.f32 %v2199_v18, %v1862_v12  ;;  %v1883_v37 = vadd.f32 %v4355_v13, %v5522_v42  ;;  %4421 = vmatprep.mubr.msk.bf16.mxu1 %vm2385_vm4, %v2340_v36  ;;  %v2322_v49 = vmax.f32 %v2290_v35, 0.0 }
 0x2bc   : > { %v1874_v38 = vpop.f32.mrf.mxu1  ;;  %v2212_v16 = vpop.f32.mrf.mxu0  ;;  %4422 = vmatmul.mubr.msk.bf16.gmra.mxu1 %vm2385_vm4, %v2341_v6 }
 0x2bd   : > { %v2325_v19 = vmax.f32 %v2293_v20, 0.0  ;;  %v2291_v21 = vadd.f32 %v5539_v62, %v2252_v15  ;;  %v1875_v40 = vadd.f32 %v1874_v38, %v5526_v44  ;;  %v2257_v22 = vadd.f32 %v4391_v14, %v1883_v37 }
 0x2be   : > { %v4356_v23 = vpop.f32.mrf.mxu1  ;;  %v4392_v39 = vpop.f32.mrf.mxu0 }
 0x2bf   : > { %v2343_v24 = vpack.c.bf16 %v2325_v19, %v2324_v17  ;;  %v2323_v50 = vmax.f32 %v2291_v21, 0.0  ;;  %v2255_v51 = vadd.f32 %v2212_v16, %v1875_v40  ;;  %v1886_v42 = vadd.f32 %v4356_v23, %v5530_v46 }
 0x2c0   : > { %v1877_v52 = vpop.f32.mrf.mxu1  ;;  %v2296_v54 = vadd.f32 %v5539_v62, %v2257_v22  ;;  %v2215_v44 = vpop.f32.mrf.mxu0 }
 0x2c1   : > { %v2342_v25 = vpack.c.bf16 %v2323_v50, %v2322_v49  ;;  %v1878_v53 = vadd.f32 %v1877_v52, %v5534_v48  ;;  %v2258_v55 = vadd.f32 %v4392_v39, %v1886_v42  ;;  %v2294_v26 = vadd.f32 %v5539_v62, %v2255_v51 }
 0x2c2   : > { %v2328_v46 = vmax.f32 %v2296_v54, 0.0 }
 0x2c3   : > { %v2256_v27 = vadd.f32 %v2215_v44, %v1878_v53  ;;  %4425 = vmatprep.mubr.msk.bf16.mxu1 %vm2385_vm4, %v2342_v25  ;;  %v2297_v56 = vadd.f32 %v5539_v62, %v2258_v55  ;;  %v2326_v29 = vmax.f32 %v2294_v26, 0.0 }
 0x2c4   : > { %4426 = vmatmul.mubr.msk.bf16.gmra.mxu1 %vm2385_vm4, %v2343_v24 }
 0x2c5   : > { %v2295_v57 = vadd.f32 %v5539_v62, %v2256_v27  ;;  %v2329_v58 = vmax.f32 %v2297_v56, 0.0 }
 0x2c7   : > { %v2327_v48 = vmax.f32 %v2295_v57, 0.0  ;;  %v2345_v41 = vpack.c.bf16 %v2329_v58, %v2328_v46 }
 0x2c9   : > { %v2344_v59 = vpack.c.bf16 %v2327_v48, %v2326_v29 }
 0x2cb   : > { %4429 = vmatprep.mubr.msk.bf16.mxu1 %vm2385_vm4, %v2344_v59 }
 0x2cc   : > { %4430 = vmatmul.mubr.msk.bf16.gmra.mxu1 %vm2385_vm4, %v2345_v41 }
 0x354   : > { %v4403_v43 = vpop.f32.mrf.mxu1 }
 0x355   : > { %v2477_v31 = vadd.f32 %v4403_v43, %v5617_v60 }
 0x356   : > { %v2468_v62 = vpop.f32.mrf.mxu1 }
 0x357   : > { %v2469_v30 = vadd.f32 %v5617_v60, %v2468_v62  ;;  %v2597_v0 = vmax.f32 %v2477_v31, 0.0 }
 0x358   : > { %v4404_v61 = vpop.f32.mrf.mxu1 }
 0x359   : > { %v2480_v63 = vadd.f32 %v4404_v61, %v5617_v60  ;;  %v2595_v47 = vmax.f32 %v2469_v30, 0.0 }
 0x35a   : > { %v2471_v45 = vpop.f32.mrf.mxu1 }
 0x35b   : > { %v2598_v1 = vmax.f32 %v2480_v63, 0.0  ;;  %v2472_v2 = vadd.f32 %v5617_v60, %v2471_v45 }
 0x35c   : > { %v4407_v3 = vpop.f32.mrf.mxu1 }
 0x35d   : > { %v5623_v32 = vpack.c.bf16 %v2598_v1, %v2597_v0  ;;  %v2596_v4 = vmax.f32 %v2472_v2, 0.0  ;;  %v2493_v34 = vadd.f32 %v4407_v3, %v5617_v60 }
 0x35e   : > { %v2484_v5 = vpop.f32.mrf.mxu1 }
 0x35f   : > { %v5625_v6 = vpack.c.bf16 %v2596_v4, %v2595_v47  ;;  %v2485_v8 = vadd.f32 %v5617_v60, %v2484_v5  ;;  %v2601_v18 = vmax.f32 %v2493_v34, 0.0 }
 0x360   : > { %v4408_v7 = vpop.f32.mrf.mxu1 }
 0x361   : > { %v2496_v33 = vadd.f32 %v4408_v7, %v5617_v60  ;;  %v2599_v12 = vmax.f32 %v2485_v8, 0.0 }
 0x362   : > { %v2487_v9 = vpop.f32.mrf.mxu1 }
 0x363   : > { %v2602_v10 = vmax.f32 %v2496_v33, 0.0  ;;  %v2488_v11 = vadd.f32 %v5617_v60, %v2487_v9 }
 0x364   : > { %v4411_v14 = vpop.f32.mrf.mxu1 }
 0x365   : > { %v5631_v36 = vpack.c.bf16 %v2602_v10, %v2601_v18  ;;  %v2600_v13 = vmax.f32 %v2488_v11, 0.0  ;;  %v2509_v4 = vadd.f32 %v4411_v14, %v5617_v60 }
 0x366   : > { %v2500_v20 = vpop.f32.mrf.mxu1 }
 0x367   : > { %v5633_v35 = vpack.c.bf16 %v2600_v13, %v2599_v12  ;;  %v2605_v12 = vmax.f32 %v2509_v4, 0.0  ;;  %v2501_v13 = vadd.f32 %v5617_v60, %v2500_v20 }
 0x368   : > { %v4412_v15 = vpop.f32.mrf.mxu1 }
 0x369   : > { %v2512_v45 = vadd.f32 %v4412_v15, %v5617_v60 }
 0x36a   : > { %v2503_v37 = vpop.f32.mrf.mxu1 }
 0x36b   : > { %v2606_v8 = vmax.f32 %v2512_v45, 0.0  ;;  %v2504_v33 = vadd.f32 %v5617_v60, %v2503_v37  ;;  %v2603_v37 = vmax.f32 %v2501_v13, 0.0  ;;  %v2644_v45 = vld [vmem:[#allocation4 + $0x8] sm:$0xff] }
 0x36c   : > { %v4415_v38 = vpop.f32.mrf.mxu1 }
 0x36d   : > { %v2525_v26 = vadd.f32 %v4415_v38, %v5617_v60  ;;  %v2632_v38 = vpack.c.bf16 %v2606_v8, %v2605_v12  ;;  %v2646_v8 = vld [vmem:[#allocation4 + $0x18] sm:$0xff] }
 0x36e   : > { %v2516_v16 = vpop.f32.mrf.mxu1 }
 0x36f   : > { %v2609_v43 = vmax.f32 %v2525_v26, 0.0  ;;  %v2517_v62 = vadd.f32 %v5617_v60, %v2516_v16  ;;  %v2604_v16 = vmax.f32 %v2504_v33, 0.0 }
 0x370   : > { %v4416_v17 = vpop.f32.mrf.mxu1 }
 0x371   : > { %v2528_v54 = vadd.f32 %v4416_v17, %v5617_v60  ;;  %v2607_v5 = vmax.f32 %v2517_v62, 0.0  ;;  %v2643_v62 = vld [vmem:[#allocation4] sm:$0xff] }
 0x372   : > { %v2519_v19 = vpop.f32.mrf.mxu1 }
 0x373   : > { %v2610_v46 = vmax.f32 %v2528_v54, 0.0  ;;  %v2520_v58 = vadd.f32 %v5617_v60, %v2519_v19 }
 0x374   : > { %v5635_v21 = vpop.f32.mrf.mxu1 }
 0x375   : > { %v2634_v0 = vpack.c.bf16 %v2610_v46, %v2609_v43  ;;  %v2608_v1 = vmax.f32 %v2520_v58, 0.0  ;;  %v4727_v46 = vld [vmem:[%s5300_s24 + $0x40] ss:$8 sps:$4 sm:$0xff]   ;;  %v4728_v58 = vld [vmem:[%s5300_s24 + $0x54] ss:$8 sps:$4 sm:$0xff]  }
 0x376   : > { %v5637_v40 = vpop.f32.mrf.mxu1 }
 0x377   : > { %v2633_v9 = vpack.c.bf16 %v2608_v1, %v2607_v5 }
 0x378   : > { %v5639_v22 = vpop.f32.mrf.mxu1 }
 0x379   : > { %v2544_v20 = vadd.f32 %v5639_v22, %v5617_v60  ;;  %v2533_v22 = vadd.f32 %v5617_v60, %v5637_v40  ;;  %v4718_v40 = vld [vmem:[%s5300_s24 + $0x10] ss:$8 sps:$4 sm:$0xff]  }
 0x37a   : > { %v5641_v23 = vpop.f32.mrf.mxu1 }
 0x37c   : > { %v4423_v39 = vpop.f32.mrf.mxu1 }
 0x37d   : > { %v2557_v14 = vadd.f32 %v4423_v39, %v5617_v60 }
 0x37e   : > { %v2548_v49 = vpop.f32.mrf.mxu1 }
 0x380   : > { %v4424_v24 = vpop.f32.mrf.mxu1 }
 0x381   : > { %v2560_v18 = vadd.f32 %v4424_v24, %v5617_v60  ;;  %v2549_v24 = vadd.f32 %v5617_v60, %v2548_v49 }
 0x382   : > { %v2551_v50 = vpop.f32.mrf.mxu1 }
 0x383   : > { %v2618_v17 = vmax.f32 %v2560_v18, 0.0  ;;  %v2552_v19 = vadd.f32 %v5617_v60, %v2551_v50  ;;  %v2615_v54 = vmax.f32 %v2549_v24, 0.0  ;;  %v2614_v50 = vmax.f32 %v2544_v20, 0.0 }
 0x384   : > { %v4427_v51 = vpop.f32.mrf.mxu1 }
 0x385   : > { %v2573_v31 = vadd.f32 %v4427_v51, %v5617_v60  ;;  %v2616_v39 = vmax.f32 %v2552_v19, 0.0 }
 0x386   : > { %v2564_v42 = vpop.f32.mrf.mxu1 }
 0x387   : > { %v2621_v34 = vmax.f32 %v2573_v31, 0.0  ;;  %v2565_v7 = vadd.f32 %v5617_v60, %v2564_v42  ;;  %v2617_v42 = vmax.f32 %v2557_v14, 0.0  ;;  %v2637_v49 = vpack.c.bf16 %v2616_v39, %v2615_v54 }
 0x388   : > { %v4428_v52 = vpop.f32.mrf.mxu1 }
 0x389   : > { %v2576_v48 = vadd.f32 %v4428_v52, %v5617_v60  ;;  %v2619_v15 = vmax.f32 %v2565_v7, 0.0  ;;  %v2631_v52 = vpack.c.bf16 %v2604_v16, %v2603_v37  ;;  %v2649_v37 = vld [vmem:[#allocation4 + $0x30] sm:$0xff] }
 0x38a   : > { %v2567_v25 = vpop.f32.mrf.mxu1 }
 0x38b   : > { %v2622_v2 = vmax.f32 %v2576_v48, 0.0  ;;  %v2568_v3 = vadd.f32 %v5617_v60, %v2567_v25  ;;  %v2638_v25 = vpack.c.bf16 %v2618_v17, %v2617_v42  ;;  %v4731_v48 = vld [vmem:[%s5300_s24 + $0x64] ss:$8 sps:$4 sm:$0xff]  }
 0x38c   : > { %v4431_v53 = vpop.f32.mrf.mxu1 }
 0x38d   : > { %v2589_v44 = vadd.f32 %v4431_v53, %v5617_v60  ;;  %v2640_v10 = vpack.c.bf16 %v2622_v2, %v2621_v34  ;;  %v2620_v11 = vmax.f32 %v2568_v3, 0.0  ;;  %v2541_v53 = vadd.f32 %v5635_v21, %v5617_v60 }
 0x38e   : > { %v2580_v55 = vpop.f32.mrf.mxu1 }
 0x38f   : > { %v2581_v56 = vadd.f32 %v5617_v60, %v2580_v55  ;;  %v2625_v41 = vmax.f32 %v2589_v44, 0.0  ;;  %v2639_v51 = vpack.c.bf16 %v2620_v11, %v2619_v15  ;;  %v2536_v55 = vadd.f32 %v5617_v60, %v5641_v23  ;;  %v2647_v11 = vld [vmem:[#allocation4 + $0x20] sm:$0xff] }
 0x390   : > { %v4432_v27 = vpop.f32.mrf.mxu1  ;;  %v2613_v44 = vmax.f32 %v2541_v53, 0.0 }
 0x391   : > { %v2592_v57 = vadd.f32 %v4432_v27, %v5617_v60  ;;  %v2623_v61 = vmax.f32 %v2581_v56, 0.0  ;;  %v2612_v21 = vmax.f32 %v2536_v55, 0.0  ;;  %v2611_v27 = vmax.f32 %v2533_v22, 0.0  ;;  %v4721_v56 = vld [vmem:[%s5300_s24 + $0x20] ss:$8 sps:$4 sm:$0xff]  }
 0x392   : > { %v2583_v29 = vpop.f32.mrf.mxu1  ;;  %v2636_v26 = vpack.c.bf16 %v2614_v50, %v2613_v44  ;;  %v2651_v55 = vld [vmem:[#allocation4 + $0x40] sm:$0xff] }
 0x393   : > { %v2626_v59 = vmax.f32 %v2592_v57, 0.0  ;;  %v2584_v28 = vadd.f32 %v5617_v60, %v2583_v29  ;;  %v2635_v23 = vpack.c.bf16 %v2612_v21, %v2611_v27  ;;  %v4716_v60 = vld [vmem:[%s5300_s24 + $0x14] ss:$8 sps:$4 sm:$0xff]   ;;  %v4730_v29 = vld [vmem:[%s5300_s24 + $0x50] ss:$8 sps:$4 sm:$0xff]   ;;  %v2652_v21 = vld [vmem:[#allocation4 + $0x48] sm:$0xff] }
 0x394   : > { %v4722_v57 = vld [vmem:[%s5300_s24 + $0x34] ss:$8 sps:$4 sm:$0xff]  }
 0x395   : > { %v2642_v30 = vpack.c.bf16 %v2626_v59, %v2625_v41  ;;  %v2624_v63 = vmax.f32 %v2584_v28, 0.0  ;;  %v4733_v41 = vld [vmem:[%s5300_s24 + $0x60] ss:$8 sps:$4 sm:$0xff]   ;;  %v4734_v59 = vld [vmem:[%s5300_s24 + $0x74] ss:$8 sps:$4 sm:$0xff]  }
 0x396   : > { %v4736_v28 = vld [vmem:[%s5300_s24 + $0x70] ss:$8 sps:$4 sm:$0xff]  }
 0x397   : > { %v2641_v47 = vpack.c.bf16 %v2624_v63, %v2623_v61  ;;  %4128 = vmatprep.subr.bf16.mxu0 %v2642_v30 }
 0x398   : > { %4129 = vmatpush3.bf16.msra.mxu0 %v2634_v0 }
 0x399   : > { %4130 = vmatprep.subr.bf16.mxu0 %v2641_v47  ;;  %v2645_v47 = vld [vmem:[#allocation4 + $0x10] sm:$0xff] }
 0x39c   : > { %4131 = vmatpush3.bf16.msra.mxu0 %v2633_v9 }
 0x39d   : > { %4132 = vmatprep.subr.bf16.mxu0 %v2640_v10 }
 0x3a0   : > { %4133 = vmatpush3.bf16.msra.mxu0 %v2632_v38  ;;  %v2648_v38 = vld [vmem:[#allocation4 + $0x28] sm:$0xff] }
 0x3a1   : > { %4134 = vmatprep.subr.bf16.mxu0 %v2639_v51 }
 0x3a4   : > { %4135 = vmatpush3.bf16.msra.mxu0 %v2631_v52 }
 0x3a5   : > { %4136 = vmatprep.subr.bf16.mxu0 %v2638_v25  ;;  %v2650_v25 = vld [vmem:[#allocation4 + $0x38] sm:$0xff] }
 0x3a8   : > { %4137 = vmatpush3.bf16.msra.mxu0 %v5631_v36  ;;  %v4713_v36 = vld [vmem:[%s5300_s24] ss:$8 sps:$4 sm:$0xff]  }
 0x3a9   : > { %4138 = vmatprep.subr.bf16.mxu0 %v2637_v49 }
 0x3ac   : > { %4139 = vmatpush3.bf16.msra.mxu0 %v5633_v35  ;;  %v4719_v35 = vld [vmem:[%s5300_s24 + $0x24] ss:$8 sps:$4 sm:$0xff]  }
 0x3ad   : > { %4140 = vmatprep.subr.bf16.mxu0 %v2636_v26 }
 0x3b0   : > { %4141 = vmatpush3.bf16.msra.mxu0 %v5623_v32  ;;  %v4724_v32 = vld [vmem:[%s5300_s24 + $0x30] ss:$8 sps:$4 sm:$0xff]  }
 0x3b1   : > { %4142 = vmatprep.subr.bf16.mxu0 %v2635_v23 }
 0x3b4   : > { %4143 = vmatpush3.bf16.msra.mxu0 %v5625_v6  ;;  %v4725_v6 = vld [vmem:[%s5300_s24 + $0x44] ss:$8 sps:$4 sm:$0xff]  }
 0x3b7   : > { %2788 = vmatmul.mubr.bf16.vlgmr.msra.gmra.mxu0 %v4713_v36 }
 0x3b8   : > { %2795 = vmatprep.mubr.bf16.mxu0 %v4716_v60 }
 0x3bf   : > { %2796 = vmatmul.mubr.bf16.gmra.mxu0 %v4718_v40  ;;  %v2653_v40 = vld [vmem:[#allocation4 + $0x50] sm:$0xff] }
 0x3c0   : > { %2803 = vmatprep.mubr.bf16.mxu0 %v4719_v35 }
 0x3c7   : > { %2804 = vmatmul.mubr.bf16.gmra.mxu0 %v4721_v56 }
 0x3c8   : > { %2811 = vmatprep.mubr.bf16.mxu0 %v4722_v57 }
 0x3cf   : > { %2812 = vmatmul.mubr.bf16.gmra.mxu0 %v4724_v32 }
 0x3d0   : > { %2819 = vmatprep.mubr.bf16.mxu0 %v4725_v6  ;;  %v2654_v6 = vld [vmem:[#allocation4 + $0x58] sm:$0xff] }
 0x3d7   : > { %2820 = vmatmul.mubr.bf16.gmra.mxu0 %v4727_v46 }
 0x3d8   : > { %2827 = vmatprep.mubr.bf16.mxu0 %v4728_v58 }
 0x3df   : > { %2828 = vmatmul.mubr.bf16.gmra.mxu0 %v4730_v29 }
 0x3e0   : > { %2835 = vmatprep.mubr.bf16.mxu0 %v4731_v48 }
 0x3e7   : > { %2836 = vmatmul.mubr.bf16.gmra.mxu0 %v4733_v41  ;;  %v2655_v41 = vld [vmem:[#allocation4 + $0x60] sm:$0xff] }
 0x3e8   : > { %2843 = vmatprep.mubr.bf16.mxu0 %v4734_v59 }
 0x3ef   : > { %2844 = vmatmul.mubr.bf16.gmra.mxu0 %v4736_v28 }
 0x477   : > { %v4144_v43 = vpop.f32.mrf.mxu0 }
 0x479   : > { %v4145_v31 = vpop.f32.mrf.mxu0 }
 0x47a   : > { %v4146_v61 = vadd.f32 %v4145_v31, %v4144_v43  ;;  %v2656_v31 = vld [vmem:[#allocation4 + $0x68] sm:$0xff] }
 0x47b   : > { %v4147_v30 = vpop.f32.mrf.mxu0 }
 0x47c   : > { %v2852_v63 = vadd.f32 %v4146_v61, %v2643_v62 }
 0x47d   : > { %v4148_v0 = vpop.f32.mrf.mxu0 }
 0x47e   : > { %2868 = vst.msk [vmem:[#allocation4] sm:$0xff] %vm2385_vm4, %v2852_v63  ;;  %v4149_v1 = vadd.f32 %v4148_v0, %v4147_v30  ;;  %v2657_v0 = vld [vmem:[#allocation4 + $0x70] sm:$0xff] }
 0x47f   : > { %v4150_v2 = vpop.f32.mrf.mxu0 }
 0x480   : > { %v2853_v3 = vadd.f32 %v4149_v1, %v2644_v45 }
 0x481   : > { %v4151_v4 = vpop.f32.mrf.mxu0 }
 0x482   : > { %2869 = vst.msk [vmem:[#allocation4 + $0x8] sm:$0xff] %vm2385_vm4, %v2853_v3  ;;  %v4152_v5 = vadd.f32 %v4151_v4, %v4150_v2  ;;  %v2658_v4 = vld [vmem:[#allocation4 + $0x78] sm:$0xff] }
 0x483   : > { %v4153_v34 = vpop.f32.mrf.mxu0 }
 0x484   : > { %v2854_v7 = vadd.f32 %v4152_v5, %v2645_v47 }
 0x485   : > { %v4154_v33 = vpop.f32.mrf.mxu0 }
 0x486   : > { %2870 = vst.msk [vmem:[#allocation4 + $0x10] sm:$0xff] %vm2385_vm4, %v2854_v7  ;;  %v4155_v9 = vadd.f32 %v4154_v33, %v4153_v34 }
 0x487   : > { %v4156_v18 = vpop.f32.mrf.mxu0 }
 0x488   : > { %v2855_v10 = vadd.f32 %v4155_v9, %v2646_v8 }
 0x489   : > { %v4157_v12 = vpop.f32.mrf.mxu0 }
 0x48a   : > { %2871 = vst.msk [vmem:[#allocation4 + $0x18] sm:$0xff] %vm2385_vm4, %v2855_v10  ;;  %v4158_v13 = vadd.f32 %v4157_v12, %v4156_v18 }
 0x48b   : > { %v4159_v14 = vpop.f32.mrf.mxu0 }
 0x48c   : > { %v2856_v15 = vadd.f32 %v4158_v13, %v2647_v11 }
 0x48d   : > { %v4160_v16 = vpop.f32.mrf.mxu0 }
 0x48e   : > { %2872 = vst.msk [vmem:[#allocation4 + $0x20] sm:$0xff] %vm2385_vm4, %v2856_v15  ;;  %v4161_v17 = vadd.f32 %v4160_v16, %v4159_v14 }
 0x48f   : > { %v4162_v19 = vpop.f32.mrf.mxu0 }
 0x490   : > { %v2857_v51 = vadd.f32 %v4161_v17, %v2648_v38 }
 0x491   : > { %v4163_v42 = vpop.f32.mrf.mxu0 }
 0x492   : > { %2873 = vst.msk [vmem:[#allocation4 + $0x28] sm:$0xff] %vm2385_vm4, %v2857_v51  ;;  %v4164_v24 = vadd.f32 %v4163_v42, %v4162_v19 }
 0x493   : > { %v4165_v52 = vpop.f32.mrf.mxu0 }
 0x494   : > { %v2858_v20 = vadd.f32 %v4164_v24, %v2649_v37 }
 0x495   : > { %v4166_v39 = vpop.f32.mrf.mxu0 }
 0x496   : > { %2874 = vst.msk [vmem:[#allocation4 + $0x30] sm:$0xff] %vm2385_vm4, %v2858_v20  ;;  %v4167_v53 = vadd.f32 %v4166_v39, %v4165_v52 }
 0x497   : > { %v4168_v54 = vpop.f32.mrf.mxu0 }
 0x498   : > { %v2859_v50 = vadd.f32 %v4167_v53, %v2650_v25 }
 0x499   : > { %v4169_v49 = vpop.f32.mrf.mxu0 }
 0x49a   : > { %2875 = vst.msk [vmem:[#allocation4 + $0x38] sm:$0xff] %vm2385_vm4, %v2859_v50  ;;  %v4170_v44 = vadd.f32 %v4169_v49, %v4168_v54 }
 0x49b   : > { %v4171_v22 = vpop.f32.mrf.mxu0 }
 0x49c   : > { %v2860_v26 = vadd.f32 %v4170_v44, %v2651_v55 }
 0x49d   : > { %v4172_v27 = vpop.f32.mrf.mxu0 }
 0x49e   : > { %2876 = vst.msk [vmem:[#allocation4 + $0x40] sm:$0xff] %vm2385_vm4, %v2860_v26  ;;  %v4173_v23 = vadd.f32 %v4172_v27, %v4171_v22 }
 0x49f   : > { %v4174_v36 = vpop.f32.mrf.mxu0 }
 0x4a0   : > { %v2861_v60 = vadd.f32 %v4173_v23, %v2652_v21 }
 0x4a1   : > { %v4175_v35 = vpop.f32.mrf.mxu0 }
 0x4a2   : > { %2877 = vst.msk [vmem:[#allocation4 + $0x48] sm:$0xff] %vm2385_vm4, %v2861_v60  ;;  %v4176_v56 = vadd.f32 %v4175_v35, %v4174_v36 }
 0x4a3   : > { %v4177_v57 = vpop.f32.mrf.mxu0 }
 0x4a4   : > { %v2862_v32 = vadd.f32 %v4176_v56, %v2653_v40 }
 0x4a5   : > { %v4178_v46 = vpop.f32.mrf.mxu0 }
 0x4a6   : > { %2878 = vst.msk [vmem:[#allocation4 + $0x50] sm:$0xff] %vm2385_vm4, %v2862_v32  ;;  %v4179_v58 = vadd.f32 %v4178_v46, %v4177_v57 }
 0x4a7   : > { %v4180_v29 = vpop.f32.mrf.mxu0 }
 0x4a8   : > { %v2863_v48 = vadd.f32 %v4179_v58, %v2654_v6 }
 0x4a9   : > { %v4181_v59 = vpop.f32.mrf.mxu0 }
 0x4aa   : > { %2879 = vst.msk [vmem:[#allocation4 + $0x58] sm:$0xff] %vm2385_vm4, %v2863_v48  ;;  %v4182_v28 = vadd.f32 %v4181_v59, %v4180_v29 }
 0x4ab   : > { %v4183_v43 = vpop.f32.mrf.mxu0 }
 0x4ac   : > { %v2864_v62 = vadd.f32 %v4182_v28, %v2655_v41 }
 0x4ad   : > { %v4184_v61 = vpop.f32.mrf.mxu0 }
 0x4ae   : > { %2880 = vst.msk [vmem:[#allocation4 + $0x60] sm:$0xff] %vm2385_vm4, %v2864_v62  ;;  %v4185_v30 = vadd.f32 %v4184_v61, %v4183_v43 }
 0x4af   : > { %v4186_v63 = vpop.f32.mrf.mxu0 }
 0x4b0   : > { %v2865_v45 = vadd.f32 %v4185_v30, %v2656_v31 }
 0x4b1   : > { %v4187_v1 = vpop.f32.mrf.mxu0 }
 0x4b2   : > { %2881 = vst.msk [vmem:[#allocation4 + $0x68] sm:$0xff] %vm2385_vm4, %v2865_v45  ;;  %v4188_v2 = vadd.f32 %v4187_v1, %v4186_v63 }
 0x4b3   : > { %v4189_v3 = vpop.f32.mrf.mxu0 }
 0x4b4   : > { %v2866_v47 = vadd.f32 %v4188_v2, %v2657_v0 }
 0x4b5   : > { %v4190_v5 = vpop.f32.mrf.mxu0 }
 0x4b6   : > { %2882 = vst.msk [vmem:[#allocation4 + $0x70] sm:$0xff] %vm2385_vm4, %v2866_v47  ;;  %v4191_v34 = vadd.f32 %v4190_v5, %v4189_v3  ;;  %2887 = sbr.rel (%p3943_p8) target bundleno = 1812 (0x714), region = 124 }
 0x4b8   : > { %v2867_v7 = vadd.f32 %v4191_v34, %v2658_v4 }
 0x4ba   : > { %2883 = vst.msk [vmem:[#allocation4 + $0x78] sm:$0xff] %vm2385_vm4, %v2867_v7 }
 0x4bb   : > { %v2922_v8 = vld [vmem:[%s5860_s5 + $0x10] sm:$0xff]  ;;  %v2920_v33 = vld [vmem:[%s5860_s5] sm:$0xff]  ;;  %v5029_v9 = vmov 0   ;;  %v2923_v18 = vld [vmem:[%s5860_s5 + $0x18] sm:$0xff]  ;;  %vm3241_vm5 = vcmask 130048  }
 0x4bc   : > { %4738 = vset.pattern.permute.xlu1 %v5029_v9  ;;  %4737 = vset.pattern.permute.xlu0 %v5029_v9  ;;  %v2921_v10 = vld [vmem:[%s5860_s5 + $0x8] sm:$0xff]  ;;  %v4739_v11 = vld [vmem:[#allocation16 + $0x18] sm:$0xff]   ;;  %v4740_v14 = vld [vmem:[#allocation16 + $0x10] sm:$0xff]  }
 0x4bd   : > { %2948 = vperm.xlu1 %4738, %v2922_v8   ;;  %2938 = vperm.xlu0 %4737, %v2920_v33   ;;  %v2925_v12 = vld [vmem:[%s5860_s5 + $0x28] sm:$0xff]  ;;  %v2924_v13 = vld [vmem:[%s5860_s5 + $0x20] sm:$0xff]  ;;  %v2927_v15 = vld [vmem:[%s5860_s5 + $0x38] sm:$0xff] }
 0x4be   : > { %4433 = vmatprep.subr.bf16.mxu0 %v4739_v11  ;;  %v2926_v38 = vld [vmem:[%s5860_s5 + $0x30] sm:$0xff]  ;;  %v5731_v17 = vld [vmem:[#allocation14] sm:$0xff]   ;;  %v2929_v19 = vld [vmem:[%s5860_s5 + $0x48] sm:$0xff] }
 0x4bf   : > { %4434 = vmatpush3.bf16.msra.mxu0 %v4739_v11  ;;  %v4741_v16 = vld [vmem:[#allocation16 + $0x8] sm:$0xff]   ;;  %v2928_v51 = vld [vmem:[%s5860_s5 + $0x40] sm:$0xff]  ;;  %v4742_v37 = vld [vmem:[#allocation16] sm:$0xff]   ;;  %4515 = vmatprep.subr.bf16.mxu1 %v5731_v17 }
 0x4c0   : > { %4435 = vmatprep.subr.bf16.mxu0 %v4740_v14  ;;  %v4744_v42 = vld [vmem:[%s5904_s16 + $0x10] sm:$0xff]   ;;  %v4745_v24 = vld [vmem:[%s5904_s16 + $0x18] sm:$0xff]   ;;  %4516 = vmatpush3.bf16.msra.mxu1 %v5731_v17  ;;  %v4746_v25 = vld [vmem:[%s5904_s16 + $0x20] sm:$0xff]  }
 0x4c1   : > { %2953 = vperm.xlu1 %4738, %v2923_v18   ;;  %2943 = vperm.xlu0 %4737, %v2921_v10   ;;  %v2931_v52 = vld [vmem:[%s5860_s5 + $0x58] sm:$0xff]  ;;  %v2930_v20 = vld [vmem:[%s5860_s5 + $0x50] sm:$0xff]  ;;  %v2933_v39 = vld [vmem:[%s5860_s5 + $0x68] sm:$0xff] }
 0x4c2   : > { %4463 = vmatprep.mubr.msk.bf16.mxu1 %vm3241_vm5, %v4744_v42  ;;  %v2932_v53 = vld [vmem:[%s5860_s5 + $0x60] sm:$0xff]  ;;  %v4747_v54 = vld [vmem:[%s5904_s16 + $0x28] sm:$0xff]   ;;  %v2935_v50 = vld [vmem:[%s5860_s5 + $0x78] sm:$0xff] }
 0x4c3   : > { %4436 = vmatpush3.bf16.msra.mxu0 %v4740_v14  ;;  %4464 = vmatmul.mubr.msk.bf16.vlgmr.msra.gmra.mxu1 %vm3241_vm5, %v4745_v24  ;;  %v2934_v55 = vld [vmem:[%s5860_s5 + $0x70] sm:$0xff]  ;;  %v4749_v44 = vld [vmem:[%s5904_s16 + $0x38] sm:$0xff]   ;;  %v2904_v27 = vld [vmem:[#allocation4] sm:$0xff] }
 0x4c4   : > { %4437 = vmatprep.subr.bf16.mxu0 %v4741_v16  ;;  %4467 = vmatprep.mubr.msk.bf16.mxu1 %vm3241_vm5, %v4746_v25  ;;  %v4748_v49 = vld [vmem:[%s5904_s16 + $0x30] sm:$0xff]   ;;  %v2907_v23 = vld [vmem:[#allocation4 + $0x18] sm:$0xff]  ;;  %v2905_v36 = vld [vmem:[#allocation4 + $0x8] sm:$0xff] }
 0x4c5   : > { %2963 = vperm.xlu1 %4738, %v2925_v12   ;;  %2958 = vperm.xlu0 %4737, %v2924_v13   ;;  %v2906_v21 = vld [vmem:[#allocation4 + $0x10] sm:$0xff]  ;;  %v2909_v6 = vld [vmem:[#allocation4 + $0x28] sm:$0xff]  ;;  %v2908_v46 = vld [vmem:[#allocation4 + $0x20] sm:$0xff] }
 0x4c6   : > { %v2911_v43 = vld [vmem:[#allocation4 + $0x38] sm:$0xff]  ;;  %v2910_v62 = vld [vmem:[#allocation4 + $0x30] sm:$0xff]  ;;  %v2913_v0 = vld [vmem:[#allocation4 + $0x48] sm:$0xff] }
 0x4c7   : > { %4438 = vmatpush3.bf16.msra.mxu0 %v4741_v16  ;;  %v2912_v1 = vld [vmem:[#allocation4 + $0x40] sm:$0xff]  ;;  %v2915_v34 = vld [vmem:[#allocation4 + $0x58] sm:$0xff]  ;;  %v2914_v7 = vld [vmem:[#allocation4 + $0x50] sm:$0xff] }
 0x4c8   : > { %4439 = vmatprep.subr.bf16.mxu0 %v4742_v37  ;;  %v2917_v11 = vld [vmem:[#allocation4 + $0x68] sm:$0xff]  ;;  %v2916_v12 = vld [vmem:[#allocation4 + $0x60] sm:$0xff] }
 0x4c9   : > { %2973 = vperm.xlu1 %4738, %v2927_v15   ;;  %2968 = vperm.xlu0 %4737, %v2926_v38   ;;  %v4750_v25 = vld [vmem:[%s5904_s16] sm:$0xff]  }
 0x4cb   : > { %4440 = vmatpush3.bf16.msra.mxu0 %v4742_v37  ;;  %4468 = vmatmul.mubr.msk.bf16.gmra.mxu1 %vm3241_vm5, %v4747_v54  ;;  %v4753_v54 = vld [vmem:[%s5870_s15 + $0x10] sm:$0xff]  }
 0x4cc   : > { %4457 = vmatprep.subr.bf16.mxu0 %v5731_v17  ;;  %4471 = vmatprep.mubr.msk.bf16.mxu1 %vm3241_vm5, %v4748_v49 }
 0x4cd   : > { %2983 = vperm.xlu1 %4738, %v2929_v19   ;;  %2978 = vperm.xlu0 %4737, %v2928_v51   ;;  %v2918_v19 = vld [vmem:[#allocation4 + $0x70] sm:$0xff] }
 0x4d1   : > { %2993 = vperm.xlu1 %4738, %v2931_v52   ;;  %2988 = vperm.xlu0 %4737, %v2930_v20  }
 0x4d3   : > { %4472 = vmatmul.mubr.msk.bf16.gmra.mxu1 %vm3241_vm5, %v4749_v44 }
 0x4d5   : > { %3003 = vperm.xlu1 %4738, %v2933_v39   ;;  %2998 = vperm.xlu0 %4737, %v2932_v53   ;;  %v4751_v39 = vld [vmem:[%s5904_s16 + $0x8] sm:$0xff]   ;;  %v4752_v53 = vld [vmem:[%s5870_s15 + $0x18] sm:$0xff]  }
 0x4d6   : > { %4475 = vmatprep.subr.bf16.mxu1 %v4752_v53 }
 0x4d7   : > { %4476 = vmatpush3.bf16.msra.mxu1 %v4752_v53 }
 0x4d8   : > { %4477 = vmatprep.subr.bf16.mxu1 %v4753_v54 }
 0x4d9   : > { %3013 = vperm.xlu1 %4738, %v2935_v50   ;;  %3008 = vperm.xlu0 %4737, %v2934_v55   ;;  %v4754_v50 = vld [vmem:[%s5870_s15 + $0x8] sm:$0xff]   ;;  %v4755_v55 = vld [vmem:[%s5870_s15] sm:$0xff]  }
 0x4db   : > { %4478 = vmatpush3.bf16.msra.mxu1 %v4753_v54 }
 0x4dc   : > { %4479 = vmatprep.subr.bf16.mxu1 %v4754_v50 }
 0x4df   : > { %4480 = vmatpush3.bf16.msra.mxu1 %v4754_v50 }
 0x4e0   : > { %4481 = vmatprep.subr.bf16.mxu1 %v4755_v55 }
 0x4e3   : > { %4482 = vmatpush3.bf16.msra.mxu1 %v4755_v55 }
 0x538   : > { %v2949_v22 = vpop.permute.xlu1 %2948  ;;  %v2939_v26 = vpop.permute.xlu0 %2938 }
 0x539   : > { %v3018_v35 = vmul.f32 %v2949_v22, %v2906_v21  ;;  %v3016_v56 = vmul.f32 %v2939_v26, %v2904_v27 }
 0x53c   : > { %v2954_v60 = vpop.permute.xlu1 %2953  ;;  %v2944_v40 = vpop.permute.xlu0 %2943 }
 0x53d   : > { %v3019_v57 = vmul.f32 %v2954_v60, %v2907_v23  ;;  %v3017_v32 = vmul.f32 %v2944_v40, %v2905_v36 }
 0x53f   : > { %v3033_v58 = vpack.c.bf16 %v3019_v57, %v3018_v35  ;;  %v3032_v29 = vpack.c.bf16 %v3017_v32, %v3016_v56 }
 0x540   : > { %v2964_v48 = vpop.permute.xlu1 %2963  ;;  %v2959_v41 = vpop.permute.xlu0 %2958 }
 0x541   : > { %v3021_v59 = vmul.f32 %v2964_v48, %v2909_v6  ;;  %v3020_v28 = vmul.f32 %v2959_v41, %v2908_v46  ;;  %4441 = vmatprep.mubr.msk.bf16.mxu0 %vm2385_vm4, %v3032_v29 }
 0x542   : > { %4442 = vmatmul.mubr.msk.bf16.vlgmr.msra.gmra.mxu0 %vm2385_vm4, %v3033_v58 }
 0x543   : > { %v3034_v31 = vpack.c.bf16 %v3021_v59, %v3020_v28  ;;  %4458 = vmatpush3.bf16.msra.mxu0 %v5731_v17  ;;  %v2919_v17 = vld [vmem:[#allocation4 + $0x78] sm:$0xff] }
 0x544   : > { %v2974_v61 = vpop.permute.xlu1 %2973  ;;  %v2969_v30 = vpop.permute.xlu0 %2968 }
 0x545   : > { %v3023_v63 = vmul.f32 %v2974_v61, %v2911_v43  ;;  %v3022_v45 = vmul.f32 %v2969_v30, %v2910_v62  ;;  %4445 = vmatprep.mubr.msk.bf16.mxu0 %vm2385_vm4, %v3034_v31 }
 0x547   : > { %v3035_v2 = vpack.c.bf16 %v3023_v63, %v3022_v45 }
 0x548   : > { %v2984_v3 = vpop.permute.xlu1 %2983  ;;  %v2979_v47 = vpop.permute.xlu0 %2978 }
 0x549   : > { %v3025_v4 = vmul.f32 %v2984_v3, %v2913_v0  ;;  %v3024_v5 = vmul.f32 %v2979_v47, %v2912_v1  ;;  %v3973_v47 = vld [vmem:[%s5869_s14] ss:$0 sm:$0xff] }
 0x54a   : > { %4446 = vmatmul.mubr.msk.bf16.gmra.mxu0 %vm2385_vm4, %v3035_v2 }
 0x54b   : > { %v3036_v8 = vpack.c.bf16 %v3025_v4, %v3024_v5 }
 0x54c   : > { %v2994_v33 = vpop.permute.xlu1 %2993  ;;  %v2989_v9 = vpop.permute.xlu0 %2988 }
 0x54d   : > { %v3027_v18 = vmul.f32 %v2994_v33, %v2915_v34  ;;  %v3026_v10 = vmul.f32 %v2989_v9, %v2914_v7  ;;  %4449 = vmatprep.mubr.msk.bf16.mxu0 %vm2385_vm4, %v3036_v8 }
 0x54f   : > { %v3037_v13 = vpack.c.bf16 %v3027_v18, %v3026_v10 }
 0x550   : > { %v3004_v14 = vpop.permute.xlu1 %3003  ;;  %v2999_v15 = vpop.permute.xlu0 %2998 }
 0x551   : > { %v3029_v38 = vmul.f32 %v3004_v14, %v2917_v11  ;;  %v3028_v16 = vmul.f32 %v2999_v15, %v2916_v12 }
 0x552   : > { %4450 = vmatmul.mubr.msk.bf16.gmra.mxu0 %vm2385_vm4, %v3037_v13 }
 0x553   : > { %v3038_v51 = vpack.c.bf16 %v3029_v38, %v3028_v16 }
 0x554   : > { %v3014_v37 = vpop.permute.xlu1 %3013  ;;  %v3009_v42 = vpop.permute.xlu0 %3008 }
 0x555   : > { %v3031_v24 = vmul.f32 %v3014_v37, %v2919_v17  ;;  %v3030_v52 = vmul.f32 %v3009_v42, %v2918_v19  ;;  %4453 = vmatprep.mubr.msk.bf16.mxu0 %vm2385_vm4, %v3038_v51 }
 0x557   : > { %v3039_v20 = vpack.c.bf16 %v3031_v24, %v3030_v52 }
 0x55a   : > { %4454 = vmatmul.mubr.msk.bf16.gmra.mxu0 %vm2385_vm4, %v3039_v20 }
 0x55b   : > { %4459 = vmatprep.mubr.msk.bf16.mxu0 %vm3241_vm5, %v4750_v25 }
 0x562   : > { %4460 = vmatmul.mubr.msk.bf16.vlgmr.msra.gmra.mxu0 %vm3241_vm5, %v4751_v39 }
 0x583   : > { %v4465_v26 = vpop.f32.mrf.mxu1 }
 0x585   : > { %v3316_v23 = vpop.f32.mrf.mxu1 }
 0x587   : > { %v4466_v40 = vpop.f32.mrf.mxu1 }
 0x589   : > { %v3319_v56 = vpop.f32.mrf.mxu1 }
 0x58b   : > { %v4469_v6 = vpop.f32.mrf.mxu1 }
 0x58d   : > { %v3332_v29 = vpop.f32.mrf.mxu1 }
 0x58f   : > { %v4470_v59 = vpop.f32.mrf.mxu1 }
 0x591   : > { %v3335_v62 = vpop.f32.mrf.mxu1 }
 0x593   : > { %v4473_v45 = vpop.f32.mrf.mxu1 }
 0x595   : > { %v3348_v33 = vpop.f32.mrf.mxu1 }
 0x597   : > { %v4474_v17 = vpop.f32.mrf.mxu1 }
 0x599   : > { %v3351_v53 = vpop.f32.mrf.mxu1 }
 0x602   : > { %v4443_v49 = vpop.f32.mrf.mxu0 }
 0x604   : > { %v3132_v44 = vpop.f32.mrf.mxu0 }
 0x606   : > { %v4444_v22 = vpop.f32.mrf.mxu0 }
 0x608   : > { %v3135_v21 = vpop.f32.mrf.mxu0 }
 0x60a   : > { %v4447_v27 = vpop.f32.mrf.mxu0 }
 0x60b   : > { %v3325_v16 = vadd.f32 %v4465_v26, %v4447_v27 }
 0x60c   : > { %v3148_v36 = vpop.f32.mrf.mxu0 }
 0x60d   : > { %v3317_v2 = vadd.f32 %v3316_v23, %v3148_v36  ;;  %v3376_v39 = vadd.f32 %v3973_v47, %v3325_v16 }
 0x60e   : > { %v4448_v60 = vpop.f32.mrf.mxu0 }
 0x60f   : > { %v3374_v18 = vadd.f32 %v3973_v47, %v3317_v2  ;;  %v3328_v11 = vadd.f32 %v4466_v40, %v4448_v60 }
 0x610   : > { %v3151_v35 = vpop.f32.mrf.mxu0 }
 0x611   : > { %v3320_v30 = vadd.f32 %v3319_v56, %v3151_v35  ;;  %v3390_v51 = vmax.f32 %v3374_v18, 0.0  ;;  %v3377_v24 = vadd.f32 %v3973_v47, %v3328_v11 }
 0x612   : > { %v4451_v57 = vpop.f32.mrf.mxu0 }
 0x613   : > { %v3375_v5 = vadd.f32 %v3973_v47, %v3320_v30  ;;  %v3393_v50 = vmax.f32 %v3377_v24, 0.0  ;;  %v3341_v26 = vadd.f32 %v4469_v6, %v4451_v57 }
 0x614   : > { %v3164_v32 = vpop.f32.mrf.mxu0 }
 0x615   : > { %v3391_v13 = vmax.f32 %v3375_v5, 0.0  ;;  %v3333_v37 = vadd.f32 %v3332_v29, %v3164_v32  ;;  %v3380_v35 = vadd.f32 %v3973_v47, %v3341_v26 }
 0x616   : > { %v4452_v46 = vpop.f32.mrf.mxu0 }
 0x617   : > { %v3404_v25 = vpack.c.bf16 %v3391_v13, %v3390_v51  ;;  %v3378_v54 = vadd.f32 %v3973_v47, %v3333_v37  ;;  %v3344_v55 = vadd.f32 %v4470_v59, %v4452_v46  ;;  %v3396_v46 = vmax.f32 %v3380_v35, 0.0 }
 0x618   : > { %v3167_v58 = vpop.f32.mrf.mxu0 }
 0x619   : > { %v3336_v14 = vadd.f32 %v3335_v62, %v3167_v58  ;;  %v3381_v23 = vadd.f32 %v3973_v47, %v3344_v55 }
 0x61a   : > { %v5813_v48 = vpop.f32.mrf.mxu0 }
 0x61b   : > { %v3379_v20 = vadd.f32 %v3973_v47, %v3336_v14  ;;  %v3397_v32 = vmax.f32 %v3381_v23, 0.0  ;;  %v3357_v59 = vadd.f32 %v4473_v45, %v5813_v48 }
 0x61c   : > { %v3180_v41 = vpop.f32.mrf.mxu0 }
 0x61d   : > { %v3349_v27 = vadd.f32 %v3348_v33, %v3180_v41  ;;  %v3407_v6 = vpack.c.bf16 %v3397_v32, %v3396_v46  ;;  %v3384_v62 = vadd.f32 %v3973_v47, %v3357_v59 }
 0x61e   : > { %v4456_v28 = vpop.f32.mrf.mxu0 }
 0x61f   : > { %v3382_v56 = vadd.f32 %v3973_v47, %v3349_v27  ;;  %v3360_v58 = vadd.f32 %v4474_v17, %v4456_v28  ;;  %v3974_v28 = vld [vmem:[%s5905_s28] ss:$0 sm:$0xff] }
 0x620   : > { %v3183_v43 = vpop.f32.mrf.mxu0 }
 0x621   : > { %v3385_v57 = vadd.f32 %v3973_v47, %v3360_v58 }
 0x622   : > { %v4461_v31 = vpop.f32.mrf.mxu0 }
 0x623   : > { %v3309_v0 = vadd.f32 %v4461_v31, %v4443_v49  ;;  %v3395_v49 = vmax.f32 %v3379_v20, 0.0  ;;  %v3401_v31 = vmax.f32 %v3385_v57, 0.0 }
 0x624   : > { %v3300_v61 = vpop.f32.mrf.mxu0 }
 0x625   : > { %v3301_v63 = vadd.f32 %v3300_v61, %v3132_v44  ;;  %v3372_v9 = vadd.f32 %v3973_v47, %v3309_v0  ;;  %v3352_v44 = vadd.f32 %v3351_v53, %v3183_v43  ;;  %v3398_v43 = vmax.f32 %v3382_v56, 0.0 }
 0x626   : > { %v4462_v1 = vpop.f32.mrf.mxu0  ;;  %v3400_v61 = vmax.f32 %v3384_v62, 0.0 }
 0x627   : > { %v3312_v3 = vadd.f32 %v4462_v1, %v4444_v22  ;;  %v3370_v34 = vadd.f32 %v3973_v47, %v3301_v63  ;;  %v3388_v19 = vmax.f32 %v3372_v9, 0.0  ;;  %v3392_v22 = vmax.f32 %v3376_v39, 0.0 }
 0x628   : > { %v3303_v4 = vpop.f32.mrf.mxu0  ;;  %v3383_v60 = vadd.f32 %v3973_v47, %v3352_v44  ;;  %v3409_v30 = vpack.c.bf16 %v3401_v31, %v3400_v61 }
 0x629   : > { %v3373_v7 = vadd.f32 %v3973_v47, %v3312_v3  ;;  %v3304_v8 = vadd.f32 %v3303_v4, %v3135_v21  ;;  %v3386_v15 = vmax.f32 %v3370_v34, 0.0  ;;  %v3394_v21 = vmax.f32 %v3378_v54, 0.0 }
 0x62a   : > { %v3405_v36 = vpack.c.bf16 %v3393_v50, %v3392_v22  ;;  %v3399_v29 = vmax.f32 %v3383_v60, 0.0 }
 0x62b   : > { %v3371_v10 = vadd.f32 %v3973_v47, %v3304_v8  ;;  %v3389_v12 = vmax.f32 %v3373_v7, 0.0  ;;  %v3406_v40 = vpack.c.bf16 %v3395_v49, %v3394_v21 }
 0x62c   : > { %v3408_v41 = vpack.c.bf16 %v3399_v29, %v3398_v43 }
 0x62d   : > { %v3387_v38 = vmax.f32 %v3371_v10, 0.0  ;;  %v3403_v52 = vpack.c.bf16 %v3389_v12, %v3388_v19 }
 0x62f   : > { %v3402_v42 = vpack.c.bf16 %v3387_v38, %v3386_v15 }
 0x631   : > { %4483 = vmatprep.mubr.msk.bf16.mxu1 %vm2385_vm4, %v3402_v42 }
 0x632   : > { %4484 = vmatmul.mubr.msk.bf16.vlgmr.msra.gmra.mxu1 %vm2385_vm4, %v3403_v52 }
 0x633   : > { %4487 = vmatprep.mubr.msk.bf16.mxu1 %vm2385_vm4, %v3404_v25 }
 0x63a   : > { %4488 = vmatmul.mubr.msk.bf16.gmra.mxu1 %vm2385_vm4, %v3405_v36 }
 0x63b   : > { %4491 = vmatprep.mubr.msk.bf16.mxu1 %vm2385_vm4, %v3406_v40 }
 0x642   : > { %4492 = vmatmul.mubr.msk.bf16.gmra.mxu1 %vm2385_vm4, %v3407_v6 }
 0x643   : > { %4495 = vmatprep.mubr.msk.bf16.mxu1 %vm2385_vm4, %v3408_v41 }
 0x64a   : > { %4496 = vmatmul.mubr.msk.bf16.gmra.mxu1 %vm2385_vm4, %v3409_v30 }
 0x6f2   : > { %v4485_v63 = vpop.f32.mrf.mxu1 }
 0x6f3   : > { %v3516_v48 = vadd.f32 %v4485_v63, %v3974_v28 }
 0x6f4   : > { %v3507_v45 = vpop.f32.mrf.mxu1 }
 0x6f5   : > { %3572 = vst [vmem:[#allocation17 + $0x10] sm:$0xff] %v3516_v48  ;;  %v3508_v0 = vadd.f32 %v3974_v28, %v3507_v45 }
 0x6f6   : > { %v4486_v1 = vpop.f32.mrf.mxu1 }
 0x6f7   : > { %3570 = vst [vmem:[#allocation17] sm:$0xff] %v3508_v0  ;;  %v3519_v2 = vadd.f32 %v4486_v1, %v3974_v28 }
 0x6f8   : > { %v3510_v3 = vpop.f32.mrf.mxu1 }
 0x6f9   : > { %3573 = vst [vmem:[#allocation17 + $0x18] sm:$0xff] %v3519_v2  ;;  %v3511_v47 = vadd.f32 %v3974_v28, %v3510_v3 }
 0x6fa   : > { %v4489_v4 = vpop.f32.mrf.mxu1 }
 0x6fb   : > { %3571 = vst [vmem:[#allocation17 + $0x8] sm:$0xff] %v3511_v47  ;;  %v3532_v5 = vadd.f32 %v4489_v4, %v3974_v28 }
 0x6fc   : > { %v3523_v34 = vpop.f32.mrf.mxu1 }
 0x6fd   : > { %3576 = vst [vmem:[#allocation17 + $0x30] sm:$0xff] %v3532_v5  ;;  %v3524_v7 = vadd.f32 %v3974_v28, %v3523_v34 }
 0x6fe   : > { %v4490_v8 = vpop.f32.mrf.mxu1 }
 0x6ff   : > { %3574 = vst [vmem:[#allocation17 + $0x20] sm:$0xff] %v3524_v7  ;;  %v3535_v33 = vadd.f32 %v4490_v8, %v3974_v28 }
 0x700   : > { %v3526_v9 = vpop.f32.mrf.mxu1 }
 0x701   : > { %3577 = vst [vmem:[#allocation17 + $0x38] sm:$0xff] %v3535_v33  ;;  %v3527_v18 = vadd.f32 %v3974_v28, %v3526_v9 }
 0x702   : > { %v4493_v10 = vpop.f32.mrf.mxu1 }
 0x703   : > { %3575 = vst [vmem:[#allocation17 + $0x28] sm:$0xff] %v3527_v18  ;;  %v3548_v11 = vadd.f32 %v4493_v10, %v3974_v28 }
 0x704   : > { %v3539_v12 = vpop.f32.mrf.mxu1 }
 0x705   : > { %3580 = vst [vmem:[#allocation17 + $0x50] sm:$0xff] %v3548_v11  ;;  %v3540_v13 = vadd.f32 %v3974_v28, %v3539_v12 }
 0x706   : > { %v4494_v14 = vpop.f32.mrf.mxu1 }
 0x707   : > { %3578 = vst [vmem:[#allocation17 + $0x40] sm:$0xff] %v3540_v13  ;;  %v3551_v15 = vadd.f32 %v4494_v14, %v3974_v28 }
 0x708   : > { %v3542_v38 = vpop.f32.mrf.mxu1 }
 0x709   : > { %3581 = vst [vmem:[#allocation17 + $0x58] sm:$0xff] %v3551_v15  ;;  %v3543_v16 = vadd.f32 %v3974_v28, %v3542_v38 }
 0x70a   : > { %v4497_v17 = vpop.f32.mrf.mxu1 }
 0x70b   : > { %3579 = vst [vmem:[#allocation17 + $0x48] sm:$0xff] %v3543_v16  ;;  %v3564_v19 = vadd.f32 %v4497_v17, %v3974_v28 }
 0x70c   : > { %v3555_v51 = vpop.f32.mrf.mxu1 }
 0x70d   : > { %3584 = vst [vmem:[#allocation17 + $0x70] sm:$0xff] %v3564_v19  ;;  %v3556_v37 = vadd.f32 %v3974_v28, %v3555_v51 }
 0x70e   : > { %v4498_v42 = vpop.f32.mrf.mxu1 }
 0x70f   : > { %3582 = vst [vmem:[#allocation17 + $0x60] sm:$0xff] %v3556_v37  ;;  %v3567_v24 = vadd.f32 %v4498_v42, %v3974_v28 }
 0x710   : > { %v3558_v52 = vpop.f32.mrf.mxu1 }
 0x711   : > { %3585 = vst [vmem:[#allocation17 + $0x78] sm:$0xff] %v3567_v24  ;;  %v3559_v20 = vadd.f32 %v3974_v28, %v3558_v52 }
 0x713   : > { %3583 = vst [vmem:[#allocation17 + $0x68] sm:$0xff] %v3559_v20 }
 0x714 PF: > { %p4583_p9 = scmp.eq.s32.totalorder %s5144_s0, 1  ;;  %s5030_s29 = smov [#allocation17]  }
 0x715   : > { %s3592_s18 = sshll.u32 %s5030_s29, 4  ;;  %s3593_s18 = int_to_ptr.vmem [resolvable:$true] %s3592_s18 }
 0x716   : > { %s4940_s8 = scalar_lea.vmem %s3593_s18, 2048  ;;  %p4947_p1 = scmp.lt.s32.totalorder %s3593_s18, %s3593_s18 }
 0x717   : > { %p4941_p11 = scmp.ne.s32.totalorder %s3593_s18, %s4940_s8  ;;  %p4948_p4 = scmp.lt.s32.totalorder %s4940_s8, %s4940_s8 }
 0x719   : > { %p4942_p0 = pnand %p4941_p11, %p4583_p9  ;;  %p4949_p10 = por %p4948_p4, %p4947_p1 }
 0x71b   : > { %p4943_p3 = pneg %p4942_p0 }
 0x71d   : > { %p4950_p6 = pnand %p4949_p10, %p4943_p3 }
 0x71f   : > { %4953 = shalt.err (!%p4950_p6)
}
 0x720   : > { %s5031_s21 = smov 128   ;;  %s5032_s6 = smov 8  }
 0x721   : > { %s5906_s20 = sld [smem:[#allocation29_spill]] }
 0x727   : > { %4544 = dma.vmem_to_hbm [thread:$0]  (%p4583_p9), %s3593_s18, 2048, %s5906_s20, [#allocation7], %s5031_s21, %s5031_s21, %s5032_s6  }
 0x728   : > { %4997 = dma.done.wait (%p4583_p9), [#allocation7], 2048  }
 0x729   : > { %4999 = vsyncadd (%p4583_p9), [#allocation7], 4294965248 }
 0x72a PF: > { %p31_p12 = scmp.ge.s32.totalorder %s5243_s1, 4   ;;  %s5907_s24 = smov %s5006_s25 }
 0x72b   : > { %s5908_s25 = smov %s5010_s26  ;;  %s5909_s26 = smov %s5255_s19 }
 0x72c   : > { %s5910_s27 = smov %s5243_s1  ;;  %33 = sbr.rel (!%p31_p12) target bundleno = 15 (0xf), region = 166 }
 0x731   :  { %3608 = vsyncpa [#allocation6], 1 }
 0x732   :  { %3610 = vsyncpa [#allocation6 + $0x1], 1 }
 0x733   :  { %3611 = vsyncpa [#allocation9], 1 }
 0x734   :  { %3612 = vsyncpa [#allocation12], 1 }
 0x735   :  { %3613 = vsyncpa [#allocation15], 1 }
 0x736   :  { %3614 = vsyncpa [#allocation7], 1 }
 0x737   :  { %3616 = vsyncpa [#allocation7 + $0x1], 1 }

</bundles_post_ra>
